<compile_context>
chip_gen: v7x
topology: tpu7x:2x2x1
jax: 0.10.0
libtpu: 0.0.40
codegen_flags: <defaults>
</compile_context>

<pallas_src>
import functools

import jax
import jax.numpy as jnp
from jax.experimental import pallas as pl
from jax.experimental.pallas import tpu as pltpu


def _pick_tile(dim, target, multiple):
    """Largest divisor of `dim` that is <= target; asserts the TPU layout
    constraint (tile equals the full dim or is a multiple of `multiple`)."""
    t = min(target, dim)
    while dim % t != 0:
        t -= 1
    assert t == dim or t % multiple == 0, (
        f"tile {t} chosen for dim {dim} violates the {multiple}-multiple TPU "
        f"layout constraint; pad the dim or pick a friendlier size")
    return t


# ------------------ shared accumulating matmul (reduction on grid axis 3) ------------------

def _acc_matmul_kernel(a_ref, b_ref, o_ref, acc_ref):
    """o = a @ b accumulated over grid axis 3 in an f32 VMEM scratch."""
    kk = pl.program_id(3)

    @pl.when(kk == 0)
    def _():
        acc_ref[...] = jnp.zeros_like(acc_ref)

    acc_ref[...] += jnp.dot(a_ref[...], b_ref[...],
                            preferred_element_type=jnp.float32)

    @pl.when(kk == pl.num_programs(3) - 1)
    def _():
        o_ref[...] = acc_ref[...].astype(o_ref.dtype)


# ------------------ q/k projection with fused RMSNorm + RoPE epilogue ------------------

def _proj_norm_rope_kernel(x_ref, w_ref, nw_ref, cos_ref, sin_ref,
                           o_ref, acc_ref, *, eps):
    """One (batch, head, s-block) tile of a head projection.  The epilogue
    (run once, on the last reduction step) applies RMSNorm over head_dim and
    RoPE in f32 before the bf16 store.  Query scaling is folded into nw."""
    kk = pl.program_id(3)

    @pl.when(kk == 0)
    def _():
        acc_ref[...] = jnp.zeros_like(acc_ref)

    acc_ref[...] += jnp.dot(x_ref[...], w_ref[...],
                            preferred_element_type=jnp.float32)

    @pl.when(kk == pl.num_programs(3) - 1)
    def _():
        y = acc_ref[...]                                        # (bm, D) f32
        d = y.shape[-1]
        var = jnp.mean(y * y, axis=-1, keepdims=True)
        yn = y * jax.lax.rsqrt(var + eps) * nw_ref[...]         # RMSNorm (per head_dim)
        rot = jnp.concatenate([-yn[..., d // 2:], yn[..., : d // 2]], axis=-1)
        o_ref[...] = (yn * cos_ref[...] + rot * sin_ref[...]).astype(o_ref.dtype)


def head_proj_norm_rope_pallas(x, w, norm_w, cos, sin, *, head_dim,
                               bm=512, bk=512, eps=1e-6):
    """x: [B, S, Hin] @ w: [Hin, Hh*D] -> head-major [B, Hh, S, D] with
    RMSNorm + RoPE applied once per element in the matmul epilogue."""
    B, S, Hin = x.shape
    D = head_dim
    assert D % 128 == 0, "head_dim must be a multiple of 128 (lane-dense tiles)"
    # TODO(synk): for head_dim < 128, pack group*head_dim heads into the lane dim.
    assert w.shape[0] == Hin and w.shape[1] % D == 0
    Hh = w.shape[1] // D
    bm = _pick_tile(S, bm, 8)
    bk = _pick_tile(Hin, bk, 128)
    nw = norm_w.astype(jnp.float32).reshape(1, D)
    cos32 = cos.astype(jnp.float32)
    sin32 = sin.astype(jnp.float32)
    return pl.pallas_call(
        functools.partial(_proj_norm_rope_kernel, eps=eps),
        out_shape=jax.ShapeDtypeStruct((B, Hh, S, D), x.dtype),
        grid_spec=pltpu.PrefetchScalarGridSpec(
            num_scalar_prefetch=0,
            grid=(B, Hh, S // bm, Hin // bk),
            in_specs=[
                pl.BlockSpec((None, bm, bk), lambda b, h, i, kk: (b, i, kk)),
                pl.BlockSpec((bk, D), lambda b, h, i, kk: (kk, h)),
                pl.BlockSpec((1, D), lambda b, h, i, kk: (0, 0)),
                # cos/sin block index depends only on i -> re-fetched only when
                # the s-block changes, not on every reduction step.
                pl.BlockSpec((bm, D), lambda b, h, i, kk: (i, 0)),
                pl.BlockSpec((bm, D), lambda b, h, i, kk: (i, 0)),
            ],
            out_specs=pl.BlockSpec((None, None, bm, D),
                                   lambda b, h, i, kk: (b, h, i, 0)),
            scratch_shapes=[pltpu.VMEM((bm, D), jnp.float32)],
        ),
        compiler_params=pltpu.CompilerParams(
            dimension_semantics=("parallel", "parallel", "parallel", "arbitrary")),
    )(x, w, nw, cos32, sin32)


def head_proj_pallas(x, w, *, head_dim, bm=512, bk=512):
    """x: [B, S, Hin] @ w: [Hin, Hh*D] -> head-major [B, Hh, S, D] (v_proj)."""
    B, S, Hin = x.shape
    D = head_dim
    assert D % 128 == 0
    assert w.shape[0] == Hin and w.shape[1] % D == 0
    Hh = w.shape[1] // D
    bm = _pick_tile(S, bm, 8)
    bk = _pick_tile(Hin, bk, 128)
    return pl.pallas_call(
        _acc_matmul_kernel,
        out_shape=jax.ShapeDtypeStruct((B, Hh, S, D), x.dtype),
        grid_spec=pltpu.PrefetchScalarGridSpec(
            num_scalar_prefetch=0,
            grid=(B, Hh, S // bm, Hin // bk),
            in_specs=[
                pl.BlockSpec((None, bm, bk), lambda b, h, i, kk: (b, i, kk)),
                pl.BlockSpec((bk, D), lambda b, h, i, kk: (kk, h)),
            ],
            out_specs=pl.BlockSpec((None, None, bm, D),
                                   lambda b, h, i, kk: (b, h, i, 0)),
            scratch_shapes=[pltpu.VMEM((bm, D), jnp.float32)],
        ),
        compiler_params=pltpu.CompilerParams(
            dimension_semantics=("parallel", "parallel", "parallel", "arbitrary")),
    )(x, w)


def o_proj_pallas(attn, wo, *, bm=512, bn=512):
    """attn: [B, Hq, S, D] (head-major) @ wo: [Hq*D, Hout] -> [B, S, Hout].
    The head axis is the reduction grid dimension, so the head-major attention
    output is consumed directly (no XLA transpose back to [B, S, Hq*D])."""
    B, Hq, S, D = attn.shape
    assert wo.shape[0] == Hq * D
    Hout = wo.shape[1]
    bm = _pick_tile(S, bm, 8)
    bn = _pick_tile(Hout, bn, 128)
    wo3 = wo.reshape(Hq, D, Hout)          # free contiguous reshape
    return pl.pallas_call(
        _acc_matmul_kernel,
        out_shape=jax.ShapeDtypeStruct((B, S, Hout), attn.dtype),
        grid_spec=pltpu.PrefetchScalarGridSpec(
            num_scalar_prefetch=0,
            grid=(B, S // bm, Hout // bn, Hq),
            in_specs=[
                pl.BlockSpec((None, None, bm, D), lambda b, i, j, h: (b, h, i, 0)),
                pl.BlockSpec((None, D, bn), lambda b, i, j, h: (h, 0, j)),
            ],
            out_specs=pl.BlockSpec((None, bm, bn), lambda b, i, j, h: (b, i, j)),
            scratch_shapes=[pltpu.VMEM((bm, bn), jnp.float32)],
        ),
        compiler_params=pltpu.CompilerParams(
            dimension_semantics=("parallel", "parallel", "parallel", "arbitrary")),
    )(attn, wo3)


# ------------------ causal GQA flash attention (q/k already normed + roped + scaled) ------------------

def _flash_gqa_kernel(qblk_ref, kblk_ref,            # scalar prefetch (SMEM)
                      q_ref, k_ref, v_ref,           # (group, T, D), (T, D), (T, D)
                      o_ref,                          # (group, T, D)
                      m_sc, l_sc, acc_sc):
    p_i = pl.program_id(2)
    qi = qblk_ref[p_i]
    ki = kblk_ref[p_i]

    group, tq, d = q_ref.shape
    tk = k_ref.shape[0]
    rows = group * tq

    @pl.when(ki == 0)
    def _():
        m_sc[...] = jnp.full_like(m_sc, -1e30)
        l_sc[...] = jnp.zeros_like(l_sc)
        acc_sc[...] = jnp.zeros_like(acc_sc)

    # Collapse the GQA group into M: one tall (group*tq, tk) MXU matmul instead
    # of `group` small batched ones; K/V tiles used directly (no broadcast copies).
    q2d = q_ref[...].reshape(rows, d)
    s = jax.lax.dot_general(
        q2d, k_ref[...], (((1,), (1,)), ((), ())),
        preferred_element_type=jnp.float32)                     # (group*tq, tk)

    # Causal mask only matters on the diagonal block; enumerated pairs guarantee
    # ki <= qi so every other block is fully visible.  Row m = g*tq + t -> the
    # within-block query position is m % tq.
    q_pos = jax.lax.broadcasted_iota(jnp.int32, (rows, tk), 0) % tq
    k_pos = jax.lax.broadcasted_iota(jnp.int32, (rows, tk), 1)
    s = jnp.where(jnp.logical_or(ki != qi, k_pos <= q_pos), s, -1e30)

    m_prev = m_sc[...]
    m_new = jnp.maximum(m_prev, s.max(axis=-1, keepdims=True))
    alpha = jnp.exp(m_prev - m_new)
    p = jnp.exp(s - m_new)
    l_sc[...] = alpha * l_sc[...] + p.sum(axis=-1, keepdims=True)
    acc_sc[...] = alpha * acc_sc[...] + jnp.dot(
        p.astype(v_ref.dtype), v_ref[...], preferred_element_type=jnp.float32)
    m_sc[...] = m_new

    @pl.when(ki == qi)   # diagonal block is the last kv block for this q block
    def _():
        out = acc_sc[...] / l_sc[...]          # exact normalize (finalize only)
        o_ref[...] = out.reshape(group, tq, d).astype(o_ref.dtype)


def flash_gqa_attention_pallas(q, k, v, *, block=256):
    """Causal GQA flash attention.  q: [B, Hq, S, D] (already normed / roped /
    scaled), k, v: [B, Hkv, S, D].  Returns [B, Hq, S, D]."""
    B, Hq, S, D = q.shape
    Hkv = k.shape[1]
    assert Hq % Hkv == 0 and D % 128 == 0
    group = Hq // Hkv
    T = _pick_tile(S, block, 8)
    nq = S // T

    # Enumerate only lower-triangular (q-block, kv-block) pairs; kv innermost,
    # so the diagonal pair is the last one for each q block.
    q_blocks, k_blocks = [], []
    for qi in range(nq):
        for ki in range(qi + 1):
            q_blocks.append(qi)
            k_blocks.append(ki)
    qblk = jnp.asarray(q_blocks, dtype=jnp.int32)
    kblk = jnp.asarray(k_blocks, dtype=jnp.int32)
    num_pairs = len(q_blocks)

    grid_spec = pltpu.PrefetchScalarGridSpec(
        num_scalar_prefetch=2,
        grid=(B, Hkv, num_pairs),
        in_specs=[
            # all `group` q-heads that share kv-head h are processed together
            pl.BlockSpec((None, group, T, D),
                         lambda b, h, p, qb, kb: (b, h, qb[p], 0)),
            pl.BlockSpec((None, None, T, D),
                         lambda b, h, p, qb, kb: (b, h, kb[p], 0)),
            pl.BlockSpec((None, None, T, D),
                         lambda b, h, p, qb, kb: (b, h, kb[p], 0)),
        ],
        out_specs=pl.BlockSpec((None, group, T, D),
                               lambda b, h, p, qb, kb: (b, h, qb[p], 0)),
        scratch_shapes=[
            pltpu.VMEM((group * T, 1), jnp.float32),   # m (running max)
            pltpu.VMEM((group * T, 1), jnp.float32),   # l (running sum)
            pltpu.VMEM((group * T, D), jnp.float32),   # acc
        ],
    )
    # TODO(synk): on v7x (2 TCs), split the q-block index into its own parallel
    # grid axis when B*Hkv < 2 so both TensorCores get work.
    return pl.pallas_call(
        _flash_gqa_kernel,
        out_shape=jax.ShapeDtypeStruct((B, Hq, S, D), q.dtype),
        grid_spec=grid_spec,
        compiler_params=pltpu.CompilerParams(
            dimension_semantics=("parallel", "parallel", "arbitrary")),
    )(qblk, kblk, q, k, v)


# ------------------------------ full forward ----------------------------------

def splash_attention_qknorm_forward(hidden_states, cos, sin, params,
                                    num_heads, num_kv_heads, head_dim,
                                    attn_block=256, eps=1e-6):
    B, S, H = hidden_states.shape
    scaling = head_dim ** -0.5

    # Q/K projections with fused RMSNorm + RoPE epilogue (query scaling folded
    # into the q-norm weight; rope is linear so scaling commutes), stored
    # head-major [B, H, S, D] directly -> no XLA transpose round trips.
    q = head_proj_norm_rope_pallas(
        hidden_states, params["wq"],
        params["q_norm_w"].astype(jnp.float32) * scaling, cos, sin,
        head_dim=head_dim, eps=eps)
    k = head_proj_norm_rope_pallas(
        hidden_states, params["wk"], params["k_norm_w"], cos, sin,
        head_dim=head_dim, eps=eps)
    v = head_proj_pallas(hidden_states, params["wv"], head_dim=head_dim)

    o = flash_gqa_attention_pallas(q, k, v, block=attn_block)   # [B, Hq, S, D]

    # TODO(synk): past_key_value cache update path not modeled (no Cache object here).
    return o_proj_pallas(o, params["wo"])                       # [B, S, H]


# ------------------------------ pure-JAX reference -----------------------------

def reference_forward(hidden_states, cos, sin, params,
                      num_heads, num_kv_heads, head_dim, eps=1e-6):
    B, S, H = hidden_states.shape
    scaling = head_dim ** -0.5

    def rmsnorm(x, w):
        var = jnp.mean(x * x, axis=-1, keepdims=True)
        return x * jax.lax.rsqrt(var + eps) * w

    def rope(x):                                   # x: [B, h, S, D]
        c = cos[None, None]
        s = sin[None, None]
        d = x.shape[-1]
        rot = jnp.concatenate([-x[..., d // 2:], x[..., : d // 2]], axis=-1)
        return x * c + rot * s

    q = (hidden_states @ params["wq"]).reshape(B, S, num_heads, head_dim)
    k = (hidden_states @ params["wk"]).reshape(B, S, num_kv_heads, head_dim)
    v = (hidden_states @ params["wv"]).reshape(B, S, num_kv_heads, head_dim)
    q = rmsnorm(q, params["q_norm_w"]).transpose(0, 2, 1, 3)
    k = rmsnorm(k, params["k_norm_w"]).transpose(0, 2, 1, 3)
    v = v.transpose(0, 2, 1, 3)
    q, k = rope(q), rope(k)
    q = q * scaling

    group = num_heads // num_kv_heads
    k = jnp.repeat(k, group, axis=1)
    v = jnp.repeat(v, group, axis=1)
    scores = jnp.einsum("bhqd,bhkd->bhqk", q, k)
    mask = jnp.tril(jnp.ones((S, S), dtype=bool))
    scores = jnp.where(mask[None, None], scores, -jnp.inf)
    p = jax.nn.softmax(scores, axis=-1)
    o = jnp.einsum("bhqk,bhkd->bhqd", p, v)
    o = o.transpose(0, 2, 1, 3).reshape(B, S, num_heads * head_dim)
    return o @ params["wo"]


# ----------------------------------- main --------------------------------------

if __name__ == "__main__":
    B, S = 2, 256
    num_heads, num_kv_heads, head_dim = 4, 2, 128   # GQA; lane-dense head_dim
    H = num_heads * head_dim                        # 512

    key = jax.random.PRNGKey(0)
    kx, kq, kk_, kv_, ko, kqn, kkn = jax.random.split(key, 7)
    x_f32 = jax.random.normal(kx, (B, S, H), dtype=jnp.float32)
    wq = jax.random.normal(kq, (H, num_heads * head_dim), jnp.float32) * 0.05
    wk = jax.random.normal(kk_, (H, num_kv_heads * head_dim), jnp.float32) * 0.05
    wv = jax.random.normal(kv_, (H, num_kv_heads * head_dim), jnp.float32) * 0.05
    wo = jax.random.normal(ko, (num_heads * head_dim, H), jnp.float32) * 0.05
    q_norm_w = 1.0 + 0.1 * jax.random.normal(kqn, (head_dim,), jnp.float32)
    k_norm_w = 1.0 + 0.1 * jax.random.normal(kkn, (head_dim,), jnp.float32)

    # Rotary embeddings (HF style), cos/sin: [S, head_dim]
    pos = jnp.arange(S, dtype=jnp.float32)
    inv_freq = 1.0 / (10000.0 ** (jnp.arange(0, head_dim, 2, jnp.float32) / head_dim))
    angles = pos[:, None] * inv_freq[None, :]
    cos = jnp.concatenate([jnp.cos(angles), jnp.cos(angles)], axis=-1)
    sin = jnp.concatenate([jnp.sin(angles), jnp.sin(angles)], axis=-1)

    # bf16 activations / projection weights -> native bf16 MXU path.
    act = jnp.bfloat16
    x = x_f32.astype(act)
    params = dict(
        wq=wq.astype(act), wk=wk.astype(act), wv=wv.astype(act), wo=wo.astype(act),
        q_norm_w=q_norm_w, k_norm_w=k_norm_w,   # norm weights / cos / sin stay f32
    )

    # attn_block=128 so S=256 exercises the lower-triangular pair enumeration
    # (3 block pairs per kv-head); raise to 256/512 for long sequences.
    out = splash_attention_qknorm_forward(
        x, cos, sin, params, num_heads, num_kv_heads, head_dim, attn_block=128)
    out = jax.block_until_ready(out)

    # Reference in f32 on the bf16-rounded inputs.
    params_ref = dict(
        wq=params["wq"].astype(jnp.float32), wk=params["wk"].astype(jnp.float32),
        wv=params["wv"].astype(jnp.float32), wo=params["wo"].astype(jnp.float32),
        q_norm_w=q_norm_w, k_norm_w=k_norm_w,
    )
    ref = reference_forward(x.astype(jnp.float32), cos, sin, params_ref,
                            num_heads, num_kv_heads, head_dim)

    out32 = out.astype(jnp.float32)
    err = float(jnp.max(jnp.abs(out32 - ref)))
    assert jnp.allclose(out32, ref, atol=1e-1, rtol=1e-1), f"max abs err {err}"

    print("KERNEL_OK")
</pallas_src>

<mosaic_0001>
module attributes {stable_mosaic.version = 11 : i64} {
  func.func @_proj_norm_rope_kernel(%arg0: i32, %arg1: i32, %arg2: i32, %arg3: i32, %arg4: memref<1x256x512xbf16, #tpu.memory_space<vmem>>, %arg5: memref<512x128xbf16, #tpu.memory_space<vmem>>, %arg6: memref<1x128xf32, #tpu.memory_space<vmem>>, %arg7: memref<256x128xf32, #tpu.memory_space<vmem>>, %arg8: memref<256x128xf32, #tpu.memory_space<vmem>>, %arg9: memref<1x1x256x128xbf16, #tpu.memory_space<vmem>>, %arg10: memref<256x128xf32, #tpu.memory_space<vmem>>) attributes {dimension_semantics = [#tpu.dimension_semantics<parallel>, #tpu.dimension_semantics<parallel>, #tpu.dimension_semantics<parallel>, #tpu.dimension_semantics<arbitrary>], iteration_bounds = array<i64: 2, 4, 1, 1>, scalar_prefetch = 0 : i64, scratch_operands = 1 : i64, tpu.core_type = #tpu.core_type<tc>, window_params = [{transform_indices = @transform_0, window_bounds = array<i64: 1, 256, 512>}, {transform_indices = @transform_1, window_bounds = array<i64: 512, 128>}, {pipeline_mode = #tpu.pipeline_mode<synchronous>, transform_indices = @transform_2, window_bounds = array<i64: 1, 128>}, {transform_indices = @transform_3, window_bounds = array<i64: 256, 128>}, {transform_indices = @transform_4, window_bounds = array<i64: 256, 128>}, {transform_indices = @transform_5, window_bounds = array<i64: 1, 1, 256, 128>}]} {
    %c0_i32 = arith.constant 0 : i32
    %0 = arith.cmpi eq, %arg3, %c0_i32 : i32
    %1 = arith.extui %0 : i1 to i32
    %c0_i32_0 = arith.constant 0 : i32
    %2 = arith.cmpi ne, %1, %c0_i32_0 : i32
    scf.if %2 {
      %cst_11 = arith.constant 0.000000e+00 : f32
      %13 = vector.broadcast %cst_11 : f32 to vector<256x128xf32>
      %c0_12 = arith.constant 0 : index
      %c0_13 = arith.constant 0 : index
      %14 = vector.load %arg10[%c0_12, %c0_13] : memref<256x128xf32, #tpu.memory_space<vmem>>, vector<256x128xf32>
      tpu.vector_store %arg10[%c0_12, %c0_13], %13 {strides = array<i32>} : memref<256x128xf32, #tpu.memory_space<vmem>>, vector<256x128xf32>,
    } else {
    }
    %c0 = arith.constant 0 : index
    %c0_1 = arith.constant 0 : index
    %3 = vector.load %arg10[%c0, %c0_1] : memref<256x128xf32, #tpu.memory_space<vmem>>, vector<256x128xf32>
    %c0_2 = arith.constant 0 : index
    %c0_3 = arith.constant 0 : index
    %c0_4 = arith.constant 0 : index
    %4 = vector.load %arg4[%c0_2, %c0_3, %c0_4] : memref<1x256x512xbf16, #tpu.memory_space<vmem>>, vector<1x256x512xbf16>
    %5 = vector.shape_cast %4 : vector<1x256x512xbf16> to vector<256x512xbf16>
    %c0_5 = arith.constant 0 : index
    %c0_6 = arith.constant 0 : index
    %6 = vector.load %arg5[%c0_5, %c0_6] : memref<512x128xbf16, #tpu.memory_space<vmem>>, vector<512x128xbf16>
    %cst = arith.constant dense<0.000000e+00> : vector<256x128xf32>
    %7 = tpu.matmul %5, %6, %cst {dimension_numbers = #tpu.dot_dimension_numbers<[1], [0], [0], [1], [0, 0, 1, 1], [], []>} : vector<256x512xbf16>, vector<512x128xbf16>, vector<256x128xf32> -> vector<256x128xf32>
    %8 = arith.addf %3, %7 : vector<256x128xf32>
    %c0_7 = arith.constant 0 : index
    %c0_8 = arith.constant 0 : index
    %9 = vector.load %arg10[%c0_7, %c0_8] : memref<256x128xf32, #tpu.memory_space<vmem>>, vector<256x128xf32>
    tpu.vector_store %arg10[%c0_7, %c0_8], %8 {strides = array<i32>} : memref<256x128xf32, #tpu.memory_space<vmem>>, vector<256x128xf32>,
    %c0_i32_9 = arith.constant 0 : i32
    %10 = arith.cmpi eq, %arg3, %c0_i32_9 : i32
    %11 = arith.extui %10 : i1 to i32
    %c0_i32_10 = arith.constant 0 : i32
    %12 = arith.cmpi ne, %11, %c0_i32_10 : i32
    scf.if %12 {
      %c0_11 = arith.constant 0 : index
      %c0_12 = arith.constant 0 : index
      %13 = vector.load %arg10[%c0_11, %c0_12] : memref<256x128xf32, #tpu.memory_space<vmem>>, vector<256x128xf32>
      %14 = arith.mulf %13, %13 : vector<256x128xf32>
      %cst_13 = arith.constant dense<0.000000e+00> : vector<256xf32>
      %15 = vector.multi_reduction <add>, %14, %cst_13 [1] : vector<256x128xf32> to vector<256xf32>
      %16 = vector.shape_cast %15 : vector<256xf32> to vector<256x1xf32>
      %cst_14 = arith.constant 1.280000e+02 : f32
      %17 = vector.broadcast %cst_14 : f32 to vector<256x1xf32>
      %18 = arith.divf %16, %17 : vector<256x1xf32>
      %cst_15 = arith.constant 9.99999997E-7 : f32
      %19 = vector.broadcast %cst_15 : f32 to vector<256x1xf32>
      %20 = arith.addf %18, %19 : vector<256x1xf32>
      %21 = math.rsqrt %20 : vector<256x1xf32>
      %22 = vector.broadcast %21 : vector<256x1xf32> to vector<256x128xf32>
      %23 = arith.mulf %13, %22 : vector<256x128xf32>
      %c0_16 = arith.constant 0 : index
      %c0_17 = arith.constant 0 : index
      %24 = vector.load %arg6[%c0_16, %c0_17] : memref<1x128xf32, #tpu.memory_space<vmem>>, vector<1x128xf32>
      %25 = vector.broadcast %24 : vector<1x128xf32> to vector<256x128xf32>
      %26 = arith.mulf %23, %25 : vector<256x128xf32>
      %27 = vector.extract_strided_slice %26 {offsets = [0, 64], sizes = [256, 64], strides = [1, 1]} : vector<256x128xf32> to vector<256x64xf32>
      %cst_18 = arith.constant 0.000000e+00 : f32
      %28 = vector.broadcast %cst_18 : f32 to vector<256x64xf32>
      %29 = arith.subf %28, %27 : vector<256x64xf32>
      %30 = vector.extract_strided_slice %26 {offsets = [0, 0], sizes = [256, 64], strides = [1, 1]} : vector<256x128xf32> to vector<256x64xf32>
      %31 = tpu.concatenate %29, %30 in 1 : vector<256x64xf32>, vector<256x64xf32> -> vector<256x128xf32>
      %c0_19 = arith.constant 0 : index
      %c0_20 = arith.constant 0 : index
      %32 = vector.load %arg7[%c0_19, %c0_20] : memref<256x128xf32, #tpu.memory_space<vmem>>, vector<256x128xf32>
      %33 = arith.mulf %26, %32 : vector<256x128xf32>
      %c0_21 = arith.constant 0 : index
      %c0_22 = arith.constant 0 : index
      %34 = vector.load %arg8[%c0_21, %c0_22] : memref<256x128xf32, #tpu.memory_space<vmem>>, vector<256x128xf32>
      %35 = arith.mulf %31, %34 : vector<256x128xf32>
      %36 = arith.addf %33, %35 : vector<256x128xf32>
      %37 = arith.truncf %36 : vector<256x128xf32> to vector<256x128xbf16>
      %c0_23 = arith.constant 0 : index
      %c0_24 = arith.constant 0 : index
      %c0_25 = arith.constant 0 : index
      %c0_26 = arith.constant 0 : index
      %38 = vector.load %arg9[%c0_23, %c0_24, %c0_25, %c0_26] : memref<1x1x256x128xbf16, #tpu.memory_space<vmem>>, vector<1x1x256x128xbf16>
      %39 = vector.shape_cast %38 : vector<1x1x256x128xbf16> to vector<256x128xbf16>
      %40 = vector.shape_cast %37 : vector<256x128xbf16> to vector<1x1x256x128xbf16>
      tpu.vector_store %arg9[%c0_23, %c0_24, %c0_25, %c0_26], %40 {strides = array<i32>} : memref<1x1x256x128xbf16, #tpu.memory_space<vmem>>, vector<1x1x256x128xbf16>,
    } else {
    }
    return
  }
  func.func @transform_0(%arg0: i32, %arg1: i32, %arg2: i32, %arg3: i32) -> (i32, i32, i32) {
    %c0_i32 = arith.constant 0 : i32
    return %arg0, %arg2, %arg3 : i32, i32, i32
  }
  func.func @transform_1(%arg0: i32, %arg1: i32, %arg2: i32, %arg3: i32) -> (i32, i32) {
    %c0_i32 = arith.constant 0 : i32
    return %arg3, %arg1 : i32, i32
  }
  func.func @transform_2(%arg0: i32, %arg1: i32, %arg2: i32, %arg3: i32) -> (i32, i32) {
    %c0_i32 = arith.constant 0 : i32
    %c0_i32_0 = arith.constant 0 : i32
    %c0_i32_1 = arith.constant 0 : i32
    return %c0_i32, %c0_i32_0 : i32, i32
  }
  func.func @transform_3(%arg0: i32, %arg1: i32, %arg2: i32, %arg3: i32) -> (i32, i32) {
    %c0_i32 = arith.constant 0 : i32
    %c0_i32_0 = arith.constant 0 : i32
    return %arg2, %c0_i32 : i32, i32
  }
  func.func @transform_4(%arg0: i32, %arg1: i32, %arg2: i32, %arg3: i32) -> (i32, i32) {
    %c0_i32 = arith.constant 0 : i32
    %c0_i32_0 = arith.constant 0 : i32
    return %arg2, %c0_i32 : i32, i32
  }
  func.func @transform_5(%arg0: i32, %arg1: i32, %arg2: i32, %arg3: i32) -> (i32, i32, i32, i32) {
    %c0_i32 = arith.constant 0 : i32
    %c0_i32_0 = arith.constant 0 : i32
    return %arg0, %arg1, %arg2, %c0_i32 : i32, i32, i32, i32
  }
}

</mosaic_0001>

<bundles_post_ra>
// kernel: tpu_custom_call.1
= control target key start
LH: loop header
LB: loop body
LE: loop exit
PB: predicated region body
PF: predicated region fallthrough
CT: control target
= control target key end

     0   :  { %s4733_s0 = inlined_call_operand.hbm [shape: bf16[2,256,512], index: 0, kind: input, shape index: {}]   ;;  %s4734_s1 = inlined_call_operand.hbm [shape: bf16[512,512], index: 1, kind: input, shape index: {}]   ;;  %s4735_s2 = inlined_call_operand.vmem [shape: f32[1,128], index: 2, kind: input, shape index: {}]   ;;  %s4736_s3 = inlined_call_operand.hbm [shape: f32[256,128], index: 3, kind: input, shape index: {}]   ;;  %s4737_s4 = inlined_call_operand.hbm [shape: f32[256,128], index: 4, kind: input, shape index: {}]   ;;  %s4738_s5 = inlined_call_operand.hbm [shape: bf16[2,4,256,128], index: 5, kind: output, shape index: {}]  }
   0x1   :  { %4755 = sst [smem:[#allocation25_spill]] %s4733_s0 }
   0x2   :  { %4756 = sst [smem:[#allocation26_spill]] %s4735_s2 }
   0x3   :  { %4757 = sst [smem:[#allocation27_spill]] %s4736_s3 }
   0x4   :  { %4758 = sst [smem:[#allocation28_spill]] %s4737_s4 }
   0x5   :  { %4759 = sst [smem:[#allocation29_spill]] %s4738_s5 }
   0x6   :  { %10 = vsyncpa [#allocation4], 0 }
   0x7   :  { %12 = vsyncpa [#allocation4 + $0x1], 0 }
   0x8   :  { %13 = vsyncpa [#allocation7], 0 }
   0x9   :  { %15 = vsyncpa [#allocation7 + $0x1], 0 }
   0xa   :  { %16 = vsyncpa [#allocation10], 0 }
   0xb   :  { %17 = vsyncpa [#allocation5], 0 }
   0xc   :  { %19 = vsyncpa [#allocation5 + $0x1], 0  ;;  %s3753_s18 = smov 0   ;;  %s3755_s19 = smov 0  }
   0xd   :  { %s3757_s20 = smov 0   ;;  %s3759_s21 = smov 0  }
   0xe   :  { %s3761_s22 = smov 0   ;;  %s3763_s23 = smov 0  }
   0xf   :  { %s3765_s24 = smov 0   ;;  %s3767_s25 = smov 0  }
  0x10   :  { %s3769_s26 = smov 0   ;;  %s3771_s27 = smov 0  }
  0x11   :  { %s3773_s28 = smov 0   ;;  %s3775_s29 = smov 0  }
  0x12   :  { %s3777_s30 = smov 0   ;;  %s3779_s6 = smov 0  }
  0x13 LB: > { %4760 = sst [smem:[#allocation17_spill]] %s3656_s18  ;;  %s3820_s7 = sadd.s32 4294967295, %s3708_s6   ;;  %s3708_s6 = sphi %s3779_s6, %s25_s6   ;;  %s3704_s30 = sphi %s3777_s30, %s4816_s30   ;;  %s3700_s29 = sphi %s3775_s29, %s4815_s29   ;;  %s3696_s28 = sphi %s3773_s28, %s4814_s28   ;;  %s3692_s27 = sphi %s3771_s27, %s4813_s27   ;;  %s3688_s26 = sphi %s3769_s26, %s4812_s26   ;;  %s3684_s25 = sphi %s3767_s25, %s4811_s25   ;;  %s3680_s24 = sphi %s3765_s24, %s4810_s24   ;;  %s3676_s23 = sphi %s3763_s23, %s4809_s23   ;;  %s3672_s22 = sphi %s3761_s22, %s4808_s22   ;;  %s3668_s21 = sphi %s3759_s21, %s4807_s21   ;;  %s3664_s20 = sphi %s3757_s20, %s4806_s20   ;;  %s3660_s19 = sphi %s3755_s19, %s4805_s19   ;;  %s3656_s18 = sphi %s3753_s18, %s4802_s18  }
  0x14   : > { %4761 = sst [smem:[#allocation18_spill]] %s3660_s19  ;;  %s2579_s8 = sadd.s32 4294967294, %s3708_s6  }
  0x15   : > { %4762 = sst [smem:[#allocation19_spill]] %s3692_s27  ;;  %p75_p0 = scmp.ne.s32.totalorder %s3684_s25, %s3680_s24 }
  0x16   : > { %4763 = sst [smem:[#allocation20_spill]] %s3696_s28  ;;  %p4744_p1 = scmp.eq.s32.totalorder %s3820_s7, 0 }
  0x17   : > { %p103_p3 = scmp.ne.s32.totalorder %s3672_s22, %s3668_s21  ;;  %p203_p5 = scmp.ne.s32.totalorder %s3664_s20, %s3660_s19 }
  0x18   : > { %p3830_p4 = por %p4744_p1, %p75_p0  ;;  %p204_p7 = scmp.eq.s32.totalorder %s3820_s7, 7 }
  0x19   : > { %p3838_p6 = por %p103_p3, %p4744_p1  ;;  %p209_p8 = scmp.ne.s32.totalorder %s3660_s19, %s3656_s18 }
  0x1a   : > { %s4764_s9 = scalar_select %p3830_p4, 1, 0 }
  0x1b   : > { %s4765_s10 = scalar_select %p3838_p6, 1, 0 }
  0x1c   : > { %p210_p9 = scmp.eq.s32.totalorder %s2579_s8, 7  ;;  %p3845_p10 = por %p204_p7, %p203_p5 }
  0x1d   : > { %4766 = sst [smem:[#allocation21_spill]] %s4765_s10  ;;  %p2580_p11 = scmp.ge.s32.totalorder %s3708_s6, 1 }
  0x1e   : > { %s4767_s11 = scalar_select %p3845_p10, 1, 0 }
  0x1f   : > { %p3850_p12 = por %p210_p9, %p209_p8  ;;  %p217_p13 = scmp.lt.s32.totalorder %s3708_s6, 9 }
  0x20   : > { %4768 = sst [smem:[#allocation22_spill]] %s4767_s11  ;;  %s3710_s14 = smov [#allocation8]  }
  0x21   : > { %s4769_s12 = scalar_select %p3850_p12, 1, 0 }
  0x22   : > { %p3855_p0 = pnand %p2580_p11, %p217_p13  ;;  %s235_s15 = sshll.u32 %s3710_s14, 4  ;;  %s236_s15 = int_to_ptr.vmem [resolvable:$true] %s235_s15 }
  0x23   : > { %4770 = sst [smem:[#allocation23_spill]] %s4769_s12  ;;  %s3711_s17 = smov [#allocation9]  }
  0x24   : > { %s4771_s13 = scalar_select %p3855_p0, 1, 0 }
  0x25   : > { %p3096_p3 = pneg %p3855_p0  ;;  %s251_s21 = sshll.u32 %s3711_s17, 4  ;;  %s3867_s21 = int_to_ptr.vmem [resolvable:$true] %s251_s21 }
  0x26   : > { %s4773_s3 = sld [smem:[#allocation27_spill]] }
  0x27   : > { %p3863_p5 = pnand %p3096_p3, %p4744_p1 }
  0x29   : > { %p3436_p8 = pneg %p3863_p5 }
  0x2c   : > { %s3434_s12 = scalar_lea.hbm %s4773_s3, 4096 }
  0x2d   : > { %p3435_p7 = scmp.ne.s32.totalorder %s4773_s3, %s3434_s12  ;;  %p3441_p13 = scmp.lt.u32.totalorder %s3434_s12, %s4773_s3 }
  0x2f   : > { %p3437_p9 = pnand %p3436_p8, %p3435_p7 }
  0x31   : > { %p3438_p11 = pneg %p3437_p9 }
  0x33   : > { %p3443_p3 = pnand %p3441_p13, %p3438_p11 }
  0x35   : > { %3446 = shalt.err (!%p3443_p3)
}
  0x36   : > { %s3447_s17 = scalar_lea.vmem %s236_s15, 4096  ;;  %p3455_p10 = scmp.lt.s32.totalorder %s236_s15, %s236_s15 }
  0x37   : > { %p3448_p1 = scmp.ne.s32.totalorder %s236_s15, %s3447_s17  ;;  %p3456_p6 = scmp.lt.s32.totalorder %s3447_s17, %s3447_s17 }
  0x39   : > { %p3450_p2 = pnand %p3448_p1, %p3436_p8  ;;  %p3457_p4 = por %p3456_p6, %p3455_p10 }
  0x3b   : > { %p3451_p12 = pneg %p3450_p2 }
  0x3d   : > { %p3458_p0 = pnand %p3457_p4, %p3451_p12 }
  0x3f   : > { %3461 = shalt.err (!%p3458_p0)
}
  0x40   : > { %s3712_s18 = smov 128   ;;  %s3713_s24 = smov 8  }
  0x41   : > { %3099 = dma.hbm_to_vmem [thread:$0]  (!%p3863_p5), %s4773_s3, 4096, %s236_s15, [#allocation7], %s3712_s18, %s3712_s18, %s3713_s24  }
  0x42   : > { %s4774_s4 = sld [smem:[#allocation28_spill]] }
  0x48   : > { %s3462_s14 = scalar_lea.hbm %s4774_s4, 4096 }
  0x49   : > { %p3463_p1 = scmp.ne.s32.totalorder %s4774_s4, %s3462_s14  ;;  %p3469_p6 = scmp.lt.u32.totalorder %s3462_s14, %s4774_s4 }
  0x4b   : > { %p3465_p2 = pnand %p3463_p1, %p3436_p8 }
  0x4d   : > { %p3466_p4 = pneg %p3465_p2 }
  0x4f   : > { %p3471_p10 = pnand %p3469_p6, %p3466_p4 }
  0x51   : > { %3474 = shalt.err (!%p3471_p10)
}
  0x52   : > { %s3475_s15 = scalar_lea.vmem %s3867_s21, 4096  ;;  %p3483_p9 = scmp.lt.s32.totalorder %s3867_s21, %s3867_s21 }
  0x53   : > { %p3476_p12 = scmp.ne.s32.totalorder %s3867_s21, %s3475_s15  ;;  %p3484_p11 = scmp.lt.s32.totalorder %s3475_s15, %s3475_s15 }
  0x55   : > { %p3478_p0 = pnand %p3476_p12, %p3436_p8  ;;  %p3485_p13 = por %p3484_p11, %p3483_p9 }
  0x57   : > { %p3479_p7 = pneg %p3478_p0 }
  0x59   : > { %p3486_p3 = pnand %p3485_p13, %p3479_p7 }
  0x5b   : > { %3489 = shalt.err (!%p3486_p3)
}
  0x5c   : > { %3102 = dma.hbm_to_vmem [thread:$0]  (!%p3863_p5), %s4774_s4, 4096, %s3867_s21, [#allocation10], %s3712_s18, %s3712_s18, %s3713_s24  }
  0x5d   : > { %s47_s28 = sadd.s32 1, %s3700_s29  ;;  %s51_s16 = sadd.s32 1, %s3704_s30 }
  0x5e   : > { %p49_p8 = scmp.ge.s32.totalorder %s47_s28, 4  ;;  %s62_s5 = sadd.s32 1, %s3688_s26 }
  0x5f   : > { %p69_p1 = scmp.ne.s32.totalorder %s3688_s26, %s3684_s25  ;;  %p70_p2 = scmp.eq.s32.totalorder %s3708_s6, 0 }
  0x60   : > { %s4818_s28 = smov (%p49_p8, %s47_s28), 0  ;;  %s4820_s16 = smov (!%p49_p8, %s51_s16), %s3704_s30 }
  0x61   : > { %4775 = sst [smem:[#allocation24_spill]] %s4818_s28  ;;  %p3925_p4 = por %p70_p2, %p69_p1 }
  0x62   : > { %s86_s21 = ssub.s32 %s3700_s29, %s4818_s28  ;;  %p53_p5 = scmp.ge.s32.totalorder %s4820_s16, 2 }
  0x63   : > { %p88_p6 = scmp.eq.s32.totalorder %s86_s21, 0  ;;  %s90_s18 = sadd.s32 1, %s3676_s23 }
  0x64   : > { %p4777_p10 = scmp.ne.s32.totalorder %s3676_s23, %s3672_s22  ;;  %s4822_s16 = smov (%p53_p5, %s4820_s16), 0 }
  0x65   : > { %s3942_s12 = scalar_select %p88_p6, %s3676_s23, %s90_s18  }
  0x66   : > { %p3935_p12 = por %p4777_p10, %p70_p2  ;;  %s55_s8 = ssub.s32 %s3704_s30, %s4822_s16 }
  0x67   : > { %s193_s14 = sadd.s32 1, %s3664_s20  ;;  %p60_p0 = scmp.eq.s32.totalorder %s55_s8, 0 }
  0x68   : > { %s188_s17 = sor.u32 %s86_s21, %s55_s8  ;;  %p4754_p9 = scmp.lt.s32.totalorder %s3708_s6, 8 }
  0x69   : > { %p191_p7 = scmp.eq.s32.totalorder %s188_s17, 0  ;;  %s265_s27 = sand.u32 1, %s3688_s26  }
  0x6a   : > { %s3949_s15 = scalar_select %p60_p0, %s3688_s26, %s62_s5  }
  0x6b   : > { %s3952_s19 = scalar_select %p191_p7, %s3664_s20, %s193_s14  }
  0x6c   : > { %s2730_s3 = sshll.u32 %s3704_s30, 13  ;;  %s2584_s4 = sshll.u32 %s265_s27, 9 }
  0x6d   : > { %s4779_s0 = sld [smem:[#allocation25_spill]]  ;;  %s269_s18 = scalar_lea.vmem [#allocation3], %s2584_s4 }
  0x6e   : > { %s281_s21 = sshll.u32 %s269_s18, 4  ;;  %p3965_p11 = pnand %p4754_p9, %p3925_p4  ;;  %s3969_s21 = int_to_ptr.vmem [resolvable:$true] %s281_s21 }
  0x6f   : > { %s3971_s8 = scalar_lea.sflag [#allocation4], %s265_s27 }
  0x70   : > { %p3492_p3 = pneg %p3965_p11 }
  0x73   : > { %s3959_s10 = scalar_lea.hbm %s4779_s0, %s2730_s3  ;;  %s3495_s28 = scalar_lea.hbm %s4779_s0, 16384 }
  0x74   : > { %s3490_s2 = scalar_lea.hbm %s3959_s10, 8192  ;;  %p3496_p2 = scmp.lt.u32.totalorder %s3959_s10, %s4779_s0 }
  0x75   : > { %p3491_p13 = scmp.ne.s32.totalorder %s3959_s10, %s3490_s2  ;;  %p3497_p4 = scmp.lt.u32.totalorder %s3495_s28, %s3490_s2 }
  0x76   : > { %p3499_p6 = scmp.lt.u32.totalorder %s3490_s2, %s3959_s10 }
  0x77   : > { %p3493_p8 = pnand %p3492_p3, %p3491_p13  ;;  %p3498_p5 = por %p3497_p4, %p3496_p2 }
  0x79   : > { %p3494_p1 = pneg %p3493_p8  ;;  %p3500_p10 = por %p3499_p6, %p3498_p5 }
  0x7b   : > { %p3501_p0 = pnand %p3500_p10, %p3494_p1 }
  0x7d   : > { %3504 = shalt.err (!%p3501_p0)
}
  0x7e   : > { %s3505_s17 = scalar_lea.vmem %s3969_s21, 8192  ;;  %s3714_s27 = smov [#allocation3]  }
  0x7f   : > { %p3506_p7 = scmp.ne.s32.totalorder %s3969_s21, %s3505_s17  ;;  %s3510_s18 = sshll.u32 %s3714_s27, 4  ;;  %s3511_s18 = int_to_ptr.vmem [resolvable:$false] %s3510_s18 }
  0x80   : > { %s3512_s3 = scalar_lea.vmem %s3511_s18, 16384  ;;  %p3513_p9 = scmp.lt.s32.totalorder %s3969_s21, %s3511_s18 }
  0x81   : > { %p3508_p13 = pnand %p3506_p7, %p3492_p3  ;;  %p3514_p2 = scmp.lt.s32.totalorder %s3512_s3, %s3505_s17 }
  0x83   : > { %p3509_p8 = pneg %p3508_p13  ;;  %p3515_p4 = por %p3514_p2, %p3513_p9 }
  0x85   : > { %p3516_p5 = pnand %p3515_p4, %p3509_p8 }
  0x87   : > { %3519 = shalt.err (!%p3516_p5)
}
  0x88   : > { %s3715_s2 = smov 256   ;;  %s3716_s4 = smov 16  }
  0x89   : > { %3106 = dma.hbm_to_vmem [thread:$0]  (!%p3965_p11), %s3959_s10, 8192, %s3969_s21, %s3971_s8, %s3715_s2, %s3715_s2, %s3716_s4  }
  0x8a   : > { %p4781_p3 = scmp.lt.s32.totalorder %s3708_s6, 8  ;;  %s291_s11 = sand.u32 1, %s3708_s6  }
  0x8b   : > { %s293_s14 = sand.u32 1, %s3676_s23   ;;  %s2588_s27 = sshll.u32 %s3700_s29, 6 }
  0x8c   : > { %p4005_p9 = pnand %p4781_p3, %p3935_p12  ;;  %s2587_s17 = sshll.u32 %s293_s14, 8 }
  0x8d   : > { %s4015_s0 = scalar_lea.hbm %s4734_s1, %s2588_s27  ;;  %s295_s10 = scalar_lea.vmem [#allocation6], %s2587_s17 }
  0x8e   : > { %s304_s24 = sshll.u32 %s295_s10, 4  ;;  %s4019_s21 = scalar_lea.sflag [#allocation7], %s291_s11  ;;  %s4017_s24 = int_to_ptr.vmem [resolvable:$true] %s304_s24 }
  0x8f   : > { %s3520_s5 = scalar_lea.hbm %s4015_s0, 4096  ;;  %p3522_p11 = pneg %p4005_p9 }
  0x90   : > { %p3521_p12 = scmp.ne.s32.totalorder %s4015_s0, %s3520_s5  ;;  %s3525_s14 = scalar_lea.hbm %s4734_s1, 16384 }
  0x91   : > { %p3526_p10 = scmp.lt.u32.totalorder %s4015_s0, %s4734_s1  ;;  %p3527_p0 = scmp.lt.u32.totalorder %s3525_s14, %s3520_s5 }
  0x92   : > { %p3523_p1 = pnand %p3522_p11, %p3521_p12  ;;  %p3529_p13 = scmp.lt.u32.totalorder %s3520_s5, %s4015_s0 }
  0x93   : > { %p3528_p7 = por %p3527_p0, %p3526_p10 }
  0x94   : > { %p3524_p6 = pneg %p3523_p1 }
  0x95   : > { %p3530_p8 = por %p3529_p13, %p3528_p7 }
  0x97   : > { %p3531_p2 = pnand %p3530_p8, %p3524_p6 }
  0x99   : > { %3534 = shalt.err (!%p3531_p2)
}
  0x9a   : > { %s3535_s11 = scalar_lea.vmem %s4017_s24, 4096  ;;  %s3717_s17 = smov [#allocation6]  }
  0x9b   : > { %p3536_p4 = scmp.ne.s32.totalorder %s4017_s24, %s3535_s11  ;;  %s3540_s3 = sshll.u32 %s3717_s17, 4  ;;  %s3541_s3 = int_to_ptr.vmem [resolvable:$false] %s3540_s3 }
  0x9c   : > { %s3542_s10 = scalar_lea.vmem %s3541_s3, 8192  ;;  %p3543_p12 = scmp.lt.s32.totalorder %s4017_s24, %s3541_s3 }
  0x9d   : > { %p3538_p5 = pnand %p3536_p4, %p3522_p11  ;;  %p3544_p1 = scmp.lt.s32.totalorder %s3542_s10, %s3535_s11 }
  0x9f   : > { %p3539_p3 = pneg %p3538_p5  ;;  %p3545_p10 = por %p3544_p1, %p3543_p12 }
  0xa1   : > { %p3546_p0 = pnand %p3545_p10, %p3539_p3 }
  0xa3   : > { %3549 = shalt.err (!%p3546_p0)
}
  0xa4   : > { %s3718_s5 = smov 64   ;;  %s3719_s8 = smov 4  }
  0xa5   : > { %3109 = dma.hbm_to_vmem [thread:$0]  (!%p4005_p9), %s4015_s0, 4096, %s4017_s24, %s4019_s21, %s3715_s2, %s3718_s5, %s3719_s8  }
  0xa6   : > { %p4783_p11 = scmp.ne.s32.totalorder %s4771_s13, 0 }
  0xa7   : > { %s318_s4 = sand.u32 (!%p4783_p11), 1, %s3684_s25   ;;  %p4784_p6 = scmp.ne.s32.totalorder (!%p4783_p11), %s4764_s9, 0 }
  0xa8   : > { %316 = sbr.rel (%p4783_p11) target bundleno = 875 (0x36b), region = 40  ;;  %s2590_s14 = sshll.u32 (!%p4783_p11), %s318_s4, 9 }
  0xa9   : > { %s319_s27 = scalar_lea.sflag (!%p4783_p11), [#allocation4], %s318_s4  ;;  %s4051_s18 = scalar_lea.vmem (!%p4783_p11), [#allocation3], %s2590_s14 }
  0xaf   : > { %3635 = dma.done.wait (%p4784_p6), %s319_s27, 8192  }
  0xb0   : > { %3637 = vsyncadd (%p4784_p6), %s319_s27, 4294959104  ;;  %s4785_s28 = sld [smem:[#allocation21_spill]]  ;;  %s327_s11 = sand.u32 1, %s3820_s7  }
  0xb1   : > { %s329_s0 = sand.u32 1, %s3672_s22   ;;  %s328_s13 = scalar_lea.sflag [#allocation7], %s327_s11 }
  0xb2   : > { %s2591_s2 = sshll.u32 %s329_s0, 8 }
  0xb3   : > { %s4059_s24 = scalar_lea.vmem [#allocation6], %s2591_s2 }
  0xb6   : > { %p4786_p9 = scmp.ne.s32.totalorder %s4785_s28, 0 }
  0xb8   : > { %3639 = dma.done.wait (%p4786_p9), %s328_s13, 4096  }
  0xb9   : > { %3641 = vsyncadd (%p4786_p9), %s328_s13, 4294963200  ;;  %p4787_p7 = scmp.eq.s32.totalorder %s3820_s7, 0 }
  0xbb   : > { %3643 = dma.done.wait (%p4787_p7), [#allocation7], 4096   ;;  %p4788_p13 = pmov %p4787_p7 }
  0xbc   : > { %p4789_p8 = pmov %p4787_p7 }
  0xbd   : > { %3645 = vsyncadd (%p4788_p13), [#allocation7], 4294963200 }
  0xbe   : > { %3647 = dma.done.wait (%p4789_p8), [#allocation10], 4096   ;;  %p4790_p2 = pmov %p4787_p7 }
  0xbf   : > { %v3242_v0 = vld [vmem:[%s4059_s24 + $0x40] sm:$0xff]   ;;  %v3246_v4 = vld [vmem:[%s4059_s24 + $0x48] sm:$0xff]   ;;  %v3250_v8 = vld [vmem:[%s4059_s24 + $0x50] sm:$0xff]   ;;  %s4791_s21 = sld [smem:[#allocation26_spill]]  ;;  %s3720_s17 = smov 64   ;;  %vm2059_vm0 = vcmask 523264  }
  0xc0   : > { %3649 = vsyncadd (%p4790_p2), [#allocation10], 4294963200  ;;  %v3243_v1 = vld [vmem:[%s4059_s24 + $0xc0] sm:$0xff]   ;;  %2858 = vmatprep.subr.bf16.mxu0 %v3242_v0  ;;  %v3247_v5 = vld [vmem:[%s4059_s24 + $0xc8] sm:$0xff]   ;;  %s4792_s3 = sld [smem:[#allocation18_spill]]  ;;  %s4793_s4 = sld [smem:[#allocation19_spill]] }
  0xc1   : > { %v3244_v2 = vld [vmem:[%s4059_s24] sm:$0xff]   ;;  %2970 = vmatprep.subr.bf16.mxu1 %v3243_v1  ;;  %v3248_v6 = vld [vmem:[%s4059_s24 + $0x8] sm:$0xff]   ;;  %v3251_v9 = vld [vmem:[%s4059_s24 + $0xd0] sm:$0xff]   ;;  %s4794_s14 = sld [smem:[#allocation20_spill]]  ;;  %s4795_s11 = sld [smem:[#allocation22_spill]] }
  0xc2   : > { %v3245_v3 = vld [vmem:[%s4059_s24 + $0x80] sm:$0xff]   ;;  %2859 = vmatpush3.bf16.msra.mxu0 %v3244_v2  ;;  %v3249_v7 = vld [vmem:[%s4059_s24 + $0x88] sm:$0xff]   ;;  %v3252_v10 = vld [vmem:[%s4059_s24 + $0x10] sm:$0xff]   ;;  %s4796_s7 = sld [smem:[#allocation29_spill]] }
  0xc3   : > { %2971 = vmatpush3.bf16.msra.mxu1 %v3245_v3  ;;  %2860 = vmatprep.subr.bf16.mxu0 %v3246_v4  ;;  %v3253_v11 = vld [vmem:[%s4059_s24 + $0x90] sm:$0xff]   ;;  %v3254_v12 = vld [vmem:[%s4059_s24 + $0x58] sm:$0xff]   ;;  %v3258_v16 = vld [vmem:[%s4059_s24 + $0x60] sm:$0xff]  }
  0xc4   : > { %2972 = vmatprep.subr.bf16.mxu1 %v3247_v5  ;;  %v3255_v13 = vld [vmem:[%s4059_s24 + $0xd8] sm:$0xff]   ;;  %v3259_v17 = vld [vmem:[%s4059_s24 + $0xe0] sm:$0xff]   ;;  %v3262_v20 = vld [vmem:[%s4059_s24 + $0x68] sm:$0xff]  }
  0xc5   : > { %v3256_v14 = vld [vmem:[%s4059_s24 + $0x18] sm:$0xff]   ;;  %v3260_v18 = vld [vmem:[%s4059_s24 + $0x20] sm:$0xff]   ;;  %v3263_v21 = vld [vmem:[%s4059_s24 + $0xe8] sm:$0xff]  }
  0xc6   : > { %2861 = vmatpush3.bf16.msra.mxu0 %v3248_v6  ;;  %v3257_v15 = vld [vmem:[%s4059_s24 + $0x98] sm:$0xff]   ;;  %v3261_v19 = vld [vmem:[%s4059_s24 + $0xa0] sm:$0xff]   ;;  %v3264_v22 = vld [vmem:[%s4059_s24 + $0x28] sm:$0xff]   ;;  %s368_s10 = sand.u32 1, %s4792_s3   ;;  %s2725_s27 = sshll.u32 %s4793_s4, 5 }
  0xc7   : > { %2973 = vmatpush3.bf16.msra.mxu1 %v3249_v7  ;;  %2862 = vmatprep.subr.bf16.mxu0 %v3250_v8  ;;  %v3265_v23 = vld [vmem:[%s4059_s24 + $0xa8] sm:$0xff]   ;;  %v3266_v24 = vld [vmem:[%s4059_s24 + $0x70] sm:$0xff]   ;;  %v3270_v28 = vld [vmem:[%s4059_s24 + $0x78] sm:$0xff]   ;;  %s2594_s5 = sshll.u32 %s368_s10, 7  ;;  %p4797_p5 = scmp.ne.s32.totalorder %s4795_s11, 0 }
  0xc8   : > { %2974 = vmatprep.subr.bf16.mxu1 %v3251_v9  ;;  %v3267_v25 = vld [vmem:[%s4059_s24 + $0xf0] sm:$0xff]   ;;  %v3271_v29 = vld [vmem:[%s4059_s24 + $0xf8] sm:$0xff]   ;;  %s4563_s8 = scalar_lea.vmem [#allocation11], %s2594_s5  ;;  %s3721_s4 = smov [#allocation11]  }
  0xc9   : > { %v3268_v26 = vld [vmem:[%s4059_s24 + $0x30] sm:$0xff]   ;;  %v3272_v30 = vld [vmem:[%s4059_s24 + $0x38] sm:$0xff]   ;;  %s2430_s2 = sshll.u32 %s4563_s8, 4  ;;  %s4650_s2 = int_to_ptr.vmem [resolvable:$true] %s2430_s2 }
  0xca   : > { %2863 = vmatpush3.bf16.msra.mxu0 %v3252_v10  ;;  %v3269_v27 = vld [vmem:[%s4059_s24 + $0xb0] sm:$0xff]   ;;  %v3273_v31 = vld [vmem:[%s4059_s24 + $0xb8] sm:$0xff]   ;;  %s3550_s5 = scalar_lea.vmem %s4650_s2, 2048 }
  0xcb   : > { %2975 = vmatpush3.bf16.msra.mxu1 %v3253_v11  ;;  %2864 = vmatprep.subr.bf16.mxu0 %v3254_v12  ;;  %v3274_v32 = vld [vmem:[%s4051_s18] ss:$16 sps:$4 sm:$0xff]   ;;  %v3276_v33 = vld [vmem:[%s4051_s18 + $0x4] ss:$16 sps:$4 sm:$0xff]   ;;  %v3277_v34 = vld [vmem:[%s4051_s18 + $0x8] ss:$16 sps:$4 sm:$0xff]   ;;  %p3551_p4 = scmp.ne.s32.totalorder %s4650_s2, %s3550_s5 }
  0xcc   : > { %2976 = vmatprep.subr.bf16.mxu1 %v3255_v13  ;;  %v3279_v35 = vld [vmem:[%s4051_s18 + $0xc] ss:$16 sps:$4 sm:$0xff]   ;;  %1118 = vmatprep.mubr.bf16.mxu0 %v3276_v33  ;;  %v3280_v36 = vld [vmem:[%s4051_s18 + $0x24] ss:$16 sps:$4 sm:$0xff]   ;;  %v3284_v38 = vld [vmem:[%s4051_s18 + $0x20] ss:$16 sps:$4 sm:$0xff]  }
  0xcd   : > { %1279 = vmatprep.mubr.bf16.mxu1 %v3279_v35  ;;  %v3282_v37 = vld [vmem:[%s4051_s18 + $0x2c] ss:$16 sps:$4 sm:$0xff]   ;;  %v3285_v39 = vld [vmem:[%s4051_s18 + $0x28] ss:$16 sps:$4 sm:$0xff]   ;;  %v3286_v40 = vld [vmem:[%s4051_s18 + $0x44] ss:$16 sps:$4 sm:$0xff]   ;;  %p3552_p3 = pnand %p3551_p4, %p4797_p5 }
  0xce   : > { %2865 = vmatpush3.bf16.msra.mxu0 %v3256_v14  ;;  %v3288_v41 = vld [vmem:[%s4051_s18 + $0x4c] ss:$16 sps:$4 sm:$0xff]   ;;  %v3290_v42 = vld [vmem:[%s4051_s18 + $0x40] ss:$16 sps:$4 sm:$0xff]   ;;  %v3291_v43 = vld [vmem:[%s4051_s18 + $0x48] ss:$16 sps:$4 sm:$0xff]  }
  0xcf   : > { %2977 = vmatpush3.bf16.msra.mxu1 %v3257_v15  ;;  %2866 = vmatprep.subr.bf16.mxu0 %v3258_v16  ;;  %v3292_v44 = vld [vmem:[%s4051_s18 + $0x64] ss:$16 sps:$4 sm:$0xff]   ;;  %v3294_v45 = vld [vmem:[%s4051_s18 + $0x6c] ss:$16 sps:$4 sm:$0xff]   ;;  %v3296_v46 = vld [vmem:[%s4051_s18 + $0x60] ss:$16 sps:$4 sm:$0xff]   ;;  %p3553_p12 = pneg %p3552_p3 }
  0xd0   : > { %2978 = vmatprep.subr.bf16.mxu1 %v3259_v17  ;;  %v3297_v47 = vld [vmem:[%s4051_s18 + $0x68] ss:$16 sps:$4 sm:$0xff]   ;;  %v3298_v48 = vld [vmem:[%s4051_s18 + $0x84] ss:$16 sps:$4 sm:$0xff]   ;;  %v3300_v49 = vld [vmem:[%s4051_s18 + $0x8c] ss:$16 sps:$4 sm:$0xff]  }
  0xd1   : > { %v3302_v50 = vld [vmem:[%s4051_s18 + $0x80] ss:$16 sps:$4 sm:$0xff]   ;;  %v3303_v51 = vld [vmem:[%s4051_s18 + $0x88] ss:$16 sps:$4 sm:$0xff]   ;;  %v3304_v52 = vld [vmem:[%s4051_s18 + $0xa4] ss:$16 sps:$4 sm:$0xff]  }
  0xd2   : > { %2867 = vmatpush3.bf16.msra.mxu0 %v3260_v18  ;;  %v3306_v53 = vld [vmem:[%s4051_s18 + $0xac] ss:$16 sps:$4 sm:$0xff]   ;;  %v3308_v54 = vld [vmem:[%s4051_s18 + $0xa0] ss:$16 sps:$4 sm:$0xff]   ;;  %v3309_v55 = vld [vmem:[%s4051_s18 + $0xa8] ss:$16 sps:$4 sm:$0xff]  }
  0xd3   : > { %2979 = vmatpush3.bf16.msra.mxu1 %v3261_v19  ;;  %2868 = vmatprep.subr.bf16.mxu0 %v3262_v20  ;;  %v3310_v56 = vld [vmem:[%s4051_s18 + $0xc4] ss:$16 sps:$4 sm:$0xff]   ;;  %v3312_v57 = vld [vmem:[%s4051_s18 + $0xcc] ss:$16 sps:$4 sm:$0xff]   ;;  %v3314_v58 = vld [vmem:[%s4051_s18 + $0xc0] ss:$16 sps:$4 sm:$0xff]  }
  0xd4   : > { %2980 = vmatprep.subr.bf16.mxu1 %v3263_v21  ;;  %v3315_v59 = vld [vmem:[%s4051_s18 + $0xc8] ss:$16 sps:$4 sm:$0xff]   ;;  %v3316_v60 = vld [vmem:[%s4051_s18 + $0xe4] ss:$16 sps:$4 sm:$0xff]   ;;  %v3318_v61 = vld [vmem:[%s4051_s18 + $0xec] ss:$16 sps:$4 sm:$0xff]  }
  0xd5   : > { %v3320_v62 = vld [vmem:[%s4051_s18 + $0xe0] ss:$16 sps:$4 sm:$0xff]   ;;  %v3321_v63 = vld [vmem:[%s4051_s18 + $0xe8] ss:$16 sps:$4 sm:$0xff]   ;;  %v3322_v0 = vld [vmem:[%s4051_s18 + $0x104] ss:$16 sps:$4 sm:$0xff]  }
  0xd6   : > { %2869 = vmatpush3.bf16.msra.mxu0 %v3264_v22  ;;  %v3324_v1 = vld [vmem:[%s4051_s18 + $0x10c] ss:$16 sps:$4 sm:$0xff]   ;;  %v3326_v2 = vld [vmem:[%s4051_s18 + $0x100] ss:$16 sps:$4 sm:$0xff]   ;;  %v3327_v3 = vld [vmem:[%s4051_s18 + $0x108] ss:$16 sps:$4 sm:$0xff]  }
  0xd7   : > { %2981 = vmatpush3.bf16.msra.mxu1 %v3265_v23  ;;  %2870 = vmatprep.subr.bf16.mxu0 %v3266_v24  ;;  %v3328_v4 = vld [vmem:[%s4051_s18 + $0x124] ss:$16 sps:$4 sm:$0xff]   ;;  %v3330_v5 = vld [vmem:[%s4051_s18 + $0x12c] ss:$16 sps:$4 sm:$0xff]   ;;  %v3332_v6 = vld [vmem:[%s4051_s18 + $0x120] ss:$16 sps:$4 sm:$0xff]  }
  0xd8   : > { %2982 = vmatprep.subr.bf16.mxu1 %v3267_v25  ;;  %v3333_v7 = vld [vmem:[%s4051_s18 + $0x128] ss:$16 sps:$4 sm:$0xff]   ;;  %v3334_v8 = vld [vmem:[%s4051_s18 + $0x144] ss:$16 sps:$4 sm:$0xff]   ;;  %v3336_v9 = vld [vmem:[%s4051_s18 + $0x14c] ss:$16 sps:$4 sm:$0xff]  }
  0xd9   : > { %v3338_v10 = vld [vmem:[%s4051_s18 + $0x140] ss:$16 sps:$4 sm:$0xff]   ;;  %v3339_v11 = vld [vmem:[%s4051_s18 + $0x148] ss:$16 sps:$4 sm:$0xff]   ;;  %v3340_v12 = vld [vmem:[%s4051_s18 + $0x164] ss:$16 sps:$4 sm:$0xff]  }
  0xda   : > { %2871 = vmatpush3.bf16.msra.mxu0 %v3268_v26  ;;  %v3342_v13 = vld [vmem:[%s4051_s18 + $0x16c] ss:$16 sps:$4 sm:$0xff]   ;;  %v3344_v14 = vld [vmem:[%s4051_s18 + $0x160] ss:$16 sps:$4 sm:$0xff]   ;;  %v3345_v15 = vld [vmem:[%s4051_s18 + $0x168] ss:$16 sps:$4 sm:$0xff]  }
  0xdb   : > { %2983 = vmatpush3.bf16.msra.mxu1 %v3269_v27  ;;  %2872 = vmatprep.subr.bf16.mxu0 %v3270_v28  ;;  %v3346_v16 = vld [vmem:[%s4051_s18 + $0x184] ss:$16 sps:$4 sm:$0xff]   ;;  %v3348_v17 = vld [vmem:[%s4051_s18 + $0x18c] ss:$16 sps:$4 sm:$0xff]   ;;  %v3350_v18 = vld [vmem:[%s4051_s18 + $0x180] ss:$16 sps:$4 sm:$0xff]  }
  0xdc   : > { %2984 = vmatprep.subr.bf16.mxu1 %v3271_v29  ;;  %v3351_v19 = vld [vmem:[%s4051_s18 + $0x188] ss:$16 sps:$4 sm:$0xff]   ;;  %v3352_v20 = vld [vmem:[%s4051_s18 + $0x1a4] ss:$16 sps:$4 sm:$0xff]   ;;  %v3354_v21 = vld [vmem:[%s4051_s18 + $0x1ac] ss:$16 sps:$4 sm:$0xff]  }
  0xdd   : > { %v3356_v22 = vld [vmem:[%s4051_s18 + $0x1a0] ss:$16 sps:$4 sm:$0xff]   ;;  %v3357_v23 = vld [vmem:[%s4051_s18 + $0x1a8] ss:$16 sps:$4 sm:$0xff]   ;;  %v3358_v24 = vld [vmem:[%s4051_s18 + $0x1c4] ss:$16 sps:$4 sm:$0xff]  }
  0xde   : > { %2873 = vmatpush3.bf16.msra.mxu0 %v3272_v30  ;;  %v3360_v25 = vld [vmem:[%s4051_s18 + $0x1cc] ss:$16 sps:$4 sm:$0xff]   ;;  %v3362_v26 = vld [vmem:[%s4051_s18 + $0x1c0] ss:$16 sps:$4 sm:$0xff]   ;;  %v3363_v27 = vld [vmem:[%s4051_s18 + $0x1c8] ss:$16 sps:$4 sm:$0xff]  }
  0xdf   : > { %2985 = vmatpush3.bf16.msra.mxu1 %v3273_v31  ;;  %v3364_v28 = vld [vmem:[%s4051_s18 + $0x1e4] ss:$16 sps:$4 sm:$0xff]   ;;  %v3366_v29 = vld [vmem:[%s4051_s18 + $0x1ec] ss:$16 sps:$4 sm:$0xff]   ;;  %v3368_v30 = vld [vmem:[%s4051_s18 + $0x1e0] ss:$16 sps:$4 sm:$0xff]  }
  0xe0   : > { %v3369_v31 = vld [vmem:[%s4051_s18 + $0x1e8] ss:$16 sps:$4 sm:$0xff]   ;;  %s2726_s18 = sshll.u32 %s4794_s14, 7  ;;  %s3554_s14 = sshll.u32 %s3721_s4, 4  ;;  %s3555_s14 = int_to_ptr.vmem [resolvable:$false] %s3554_s14 }
  0xe1   : > { %1119 = vmatmul.mubr.bf16.vlgmr.msra.gmra.mrb[0].mxu0 %v3274_v32  ;;  %s2427_s28 = sadd.s32 %s2726_s18, %s2725_s27  ;;  %s3556_s27 = scalar_lea.vmem %s3555_s14, 4096 }
  0xe2   : > { %1280 = vmatmul.mubr.bf16.vlgmr.msra.gmra.mrb[0].mxu1 %v3277_v34  ;;  %1126 = vmatprep.mubr.bf16.mxu0 %v3280_v36  ;;  %s2727_s0 = sshll.u32 %s2427_s28, 6  ;;  %p3557_p1 = scmp.lt.s32.totalorder %s4650_s2, %s3555_s14 }
  0xe3   : > { %1287 = vmatprep.mubr.bf16.mxu1 %v3282_v37  ;;  %s4648_s9 = scalar_lea.hbm %s4796_s7, %s2727_s0  ;;  %p3558_p10 = scmp.lt.s32.totalorder %s3556_s27, %s3550_s5 }
  0xe5   : > { %p3559_p0 = por %p3558_p10, %p3557_p1 }
  0xe7   : > { %p3560_p11 = pnand %p3559_p0, %p3553_p12 }
  0xe9   : > { %1127 = vmatmul.mubr.bf16.gmra.mrb[4].mxu0 %v3284_v38 }
  0xea   : > { %1288 = vmatmul.mubr.bf16.gmra.mrb[4].mxu1 %v3285_v39  ;;  %1134 = vmatprep.mubr.bf16.mxu0 %v3286_v40 }
  0xeb   : > { %1295 = vmatprep.mubr.bf16.mxu1 %v3288_v41 }
  0xf1   : > { %1135 = vmatmul.mubr.bf16.gmra.mrb[8].mxu0 %v3290_v42 }
  0xf2   : > { %1296 = vmatmul.mubr.bf16.gmra.mrb[8].mxu1 %v3291_v43  ;;  %1142 = vmatprep.mubr.bf16.mxu0 %v3292_v44 }
  0xf3   : > { %1303 = vmatprep.mubr.bf16.mxu1 %v3294_v45 }
  0xf9   : > { %1143 = vmatmul.mubr.bf16.gmra.mrb[12].mxu0 %v3296_v46 }
  0xfa   : > { %1304 = vmatmul.mubr.bf16.gmra.mrb[12].mxu1 %v3297_v47  ;;  %1150 = vmatprep.mubr.bf16.mxu0 %v3298_v48 }
  0xfb   : > { %1311 = vmatprep.mubr.bf16.mxu1 %v3300_v49 }
 0x101   : > { %1151 = vmatmul.mubr.bf16.gmra.mrb[16].mxu0 %v3302_v50 }
 0x102   : > { %1312 = vmatmul.mubr.bf16.gmra.mrb[16].mxu1 %v3303_v51  ;;  %1158 = vmatprep.mubr.bf16.mxu0 %v3304_v52 }
 0x103   : > { %1319 = vmatprep.mubr.bf16.mxu1 %v3306_v53 }
 0x109   : > { %1159 = vmatmul.mubr.bf16.gmra.mrb[20].mxu0 %v3308_v54 }
 0x10a   : > { %1320 = vmatmul.mubr.bf16.gmra.mrb[20].mxu1 %v3309_v55  ;;  %1166 = vmatprep.mubr.bf16.mxu0 %v3310_v56 }
 0x10b   : > { %1327 = vmatprep.mubr.bf16.mxu1 %v3312_v57 }
 0x111   : > { %1167 = vmatmul.mubr.bf16.gmra.mrb[24].mxu0 %v3314_v58 }
 0x112   : > { %1328 = vmatmul.mubr.bf16.gmra.mrb[24].mxu1 %v3315_v59  ;;  %1174 = vmatprep.mubr.bf16.mxu0 %v3316_v60 }
 0x113   : > { %1335 = vmatprep.mubr.bf16.mxu1 %v3318_v61 }
 0x119   : > { %1175 = vmatmul.mubr.bf16.gmra.mrb[28].mxu0 %v3320_v62 }
 0x11a   : > { %1336 = vmatmul.mubr.bf16.gmra.mrb[28].mxu1 %v3321_v63  ;;  %1182 = vmatprep.mubr.bf16.mxu0 %v3322_v0 }
 0x11b   : > { %1343 = vmatprep.mubr.bf16.mxu1 %v3324_v1 }
 0x121   : > { %1183 = vmatmul.mubr.bf16.gmra.mrb[32].mxu0 %v3326_v2 }
 0x122   : > { %1344 = vmatmul.mubr.bf16.gmra.mrb[32].mxu1 %v3327_v3  ;;  %1190 = vmatprep.mubr.bf16.mxu0 %v3328_v4 }
 0x123   : > { %1351 = vmatprep.mubr.bf16.mxu1 %v3330_v5 }
 0x129   : > { %1191 = vmatmul.mubr.bf16.gmra.mrb[36].mxu0 %v3332_v6 }
 0x12a   : > { %1352 = vmatmul.mubr.bf16.gmra.mrb[36].mxu1 %v3333_v7  ;;  %1198 = vmatprep.mubr.bf16.mxu0 %v3334_v8 }
 0x12b   : > { %1359 = vmatprep.mubr.bf16.mxu1 %v3336_v9 }
 0x131   : > { %1199 = vmatmul.mubr.bf16.gmra.mrb[40].mxu0 %v3338_v10 }
 0x132   : > { %1360 = vmatmul.mubr.bf16.gmra.mrb[40].mxu1 %v3339_v11  ;;  %1206 = vmatprep.mubr.bf16.mxu0 %v3340_v12 }
 0x133   : > { %1367 = vmatprep.mubr.bf16.mxu1 %v3342_v13 }
 0x139   : > { %1207 = vmatmul.mubr.bf16.gmra.mrb[44].mxu0 %v3344_v14 }
 0x13a   : > { %1368 = vmatmul.mubr.bf16.gmra.mrb[44].mxu1 %v3345_v15  ;;  %1214 = vmatprep.mubr.bf16.mxu0 %v3346_v16 }
 0x13b   : > { %1375 = vmatprep.mubr.bf16.mxu1 %v3348_v17 }
 0x141   : > { %1215 = vmatmul.mubr.bf16.gmra.mrb[48].mxu0 %v3350_v18 }
 0x142   : > { %1376 = vmatmul.mubr.bf16.gmra.mrb[48].mxu1 %v3351_v19  ;;  %1222 = vmatprep.mubr.bf16.mxu0 %v3352_v20 }
 0x143   : > { %1383 = vmatprep.mubr.bf16.mxu1 %v3354_v21 }
 0x149   : > { %1223 = vmatmul.mubr.bf16.gmra.mrb[52].mxu0 %v3356_v22 }
 0x14a   : > { %1384 = vmatmul.mubr.bf16.gmra.mrb[52].mxu1 %v3357_v23  ;;  %1230 = vmatprep.mubr.bf16.mxu0 %v3358_v24 }
 0x14b   : > { %1391 = vmatprep.mubr.bf16.mxu1 %v3360_v25 }
 0x151   : > { %1231 = vmatmul.mubr.bf16.gmra.mrb[56].mxu0 %v3362_v26 }
 0x152   : > { %1392 = vmatmul.mubr.bf16.gmra.mrb[56].mxu1 %v3363_v27  ;;  %1238 = vmatprep.mubr.bf16.mxu0 %v3364_v28 }
 0x153   : > { %1399 = vmatprep.mubr.bf16.mxu1 %v3366_v29 }
 0x159   : > { %1239 = vmatmul.mubr.bf16.gmra.mrb[60].mxu0 %v3368_v30 }
 0x15a   : > { %1400 = vmatmul.mubr.bf16.gmra.mrb[60].mxu1 %v3369_v31 }
 0x1b4   : > { %v2874_v32 = vpop.f32.mrb[0].mxu0 }
 0x1b5   : > { %v2986_v33 = vpop.f32.mrb[0].mxu1  ;;  %v2875_v34 = vpop.f32.mrb[1].mxu0 }
 0x1b6   : > { %v2876_v35 = vadd.f32 %v2875_v34, %v2874_v32  ;;  %v2987_v36 = vpop.f32.mrb[1].mxu1  ;;  %v2877_v37 = vpop.f32.mrb[2].mxu0 }
 0x1b7   : > { %v2988_v38 = vadd.f32 %v2987_v36, %v2986_v33  ;;  %v2989_v39 = vpop.f32.mrb[2].mxu1  ;;  %v2878_v40 = vpop.f32.mrb[3].mxu0 }
 0x1b8   : > { %v2879_v41 = vadd.f32 %v2878_v40, %v2877_v37  ;;  %v2990_v42 = vpop.f32.mrb[3].mxu1 }
 0x1b9   : > { %v2991_v43 = vadd.f32 %v2990_v42, %v2989_v39  ;;  %v4169_v44 = vadd.f32 %v2988_v38, %v2876_v35 }
 0x1bb   : > { %v4171_v45 = vadd.f32 %v2991_v43, %v2879_v41  ;;  %v1507_v46 = vmul.f32 %v4169_v44, %v4169_v44 }
 0x1bc   : > { %v2880_v47 = vpop.f32.mrb[4].mxu0 }
 0x1bd   : > { %v2992_v48 = vpop.f32.mrb[4].mxu1  ;;  %1539 = vadd.xlane.f32.xlu0 %v1507_v46  ;;  %v2881_v49 = vpop.f32.mrb[5].mxu0  ;;  %v1508_v56 = vmul.f32 %v4171_v45, %v4171_v45 }
 0x1be   : > { %v2882_v50 = vadd.f32 %v2881_v49, %v2880_v47  ;;  %v2993_v51 = vpop.f32.mrb[5].mxu1  ;;  %v2883_v52 = vpop.f32.mrb[6].mxu0 }
 0x1bf   : > { %v2994_v53 = vadd.f32 %v2993_v51, %v2992_v48  ;;  %v2995_v54 = vpop.f32.mrb[6].mxu1  ;;  %v2884_v55 = vpop.f32.mrb[7].mxu0 }
 0x1c0   : > { %v2885_v57 = vadd.f32 %v2884_v55, %v2883_v52  ;;  %v2996_v58 = vpop.f32.mrb[7].mxu1 }
 0x1c1   : > { %v2997_v59 = vadd.f32 %v2996_v58, %v2995_v54  ;;  %1541 = vadd.xlane.f32.xlu0 %v1508_v56  ;;  %v4177_v60 = vadd.f32 %v2994_v53, %v2882_v50 }
 0x1c3   : > { %v4179_v61 = vadd.f32 %v2997_v59, %v2885_v57  ;;  %v1509_v62 = vmul.f32 %v4177_v60, %v4177_v60 }
 0x1c4   : > { %v2886_v63 = vpop.f32.mrb[8].mxu0 }
 0x1c5   : > { %v2998_v0 = vpop.f32.mrb[8].mxu1  ;;  %1543 = vadd.xlane.f32.xlu1 %v1509_v62  ;;  %v2887_v1 = vpop.f32.mrb[9].mxu0  ;;  %v1510_v8 = vmul.f32 %v4179_v61, %v4179_v61 }
 0x1c6   : > { %v2888_v2 = vadd.f32 %v2887_v1, %v2886_v63  ;;  %v2999_v3 = vpop.f32.mrb[9].mxu1  ;;  %v2889_v4 = vpop.f32.mrb[10].mxu0 }
 0x1c7   : > { %v3000_v5 = vadd.f32 %v2999_v3, %v2998_v0  ;;  %v3001_v6 = vpop.f32.mrb[10].mxu1  ;;  %v2890_v7 = vpop.f32.mrb[11].mxu0 }
 0x1c8   : > { %v2891_v9 = vadd.f32 %v2890_v7, %v2889_v4  ;;  %v3002_v10 = vpop.f32.mrb[11].mxu1 }
 0x1c9   : > { %v4185_v11 = vadd.f32 %v3000_v5, %v2888_v2  ;;  %v3003_v12 = vadd.f32 %v3002_v10, %v3001_v6  ;;  %1545 = vadd.xlane.f32.xlu1 %v1510_v8 }
 0x1cb   : > { %v4187_v13 = vadd.f32 %v3003_v12, %v2891_v9  ;;  %v1511_v14 = vmul.f32 %v4185_v11, %v4185_v11 }
 0x1cc   : > { %v2892_v15 = vpop.f32.mrb[12].mxu0 }
 0x1cd   : > { %v3004_v16 = vpop.f32.mrb[12].mxu1  ;;  %1547 = vadd.xlane.f32.xlu0 %v1511_v14  ;;  %v2893_v17 = vpop.f32.mrb[13].mxu0  ;;  %v1512_v18 = vmul.f32 %v4187_v13, %v4187_v13 }
 0x1ce   : > { %v2894_v19 = vadd.f32 %v2893_v17, %v2892_v15  ;;  %v3005_v20 = vpop.f32.mrb[13].mxu1  ;;  %v2895_v21 = vpop.f32.mrb[14].mxu0 }
 0x1cf   : > { %v3006_v22 = vadd.f32 %v3005_v20, %v3004_v16  ;;  %v3007_v23 = vpop.f32.mrb[14].mxu1  ;;  %1549 = vadd.xlane.f32.xlu1 %v1512_v18  ;;  %v2896_v24 = vpop.f32.mrb[15].mxu0 }
 0x1d0   : > { %v2897_v25 = vadd.f32 %v2896_v24, %v2895_v21  ;;  %v3008_v26 = vpop.f32.mrb[15].mxu1 }
 0x1d1   : > { %v4193_v27 = vadd.f32 %v3006_v22, %v2894_v19  ;;  %v3009_v28 = vadd.f32 %v3008_v26, %v3007_v23 }
 0x1d3   : > { %v4195_v29 = vadd.f32 %v3009_v28, %v2897_v25  ;;  %v1513_v30 = vmul.f32 %v4193_v27, %v4193_v27 }
 0x1d4   : > { %v2898_v31 = vpop.f32.mrb[16].mxu0 }
 0x1d5   : > { %v3010_v32 = vpop.f32.mrb[16].mxu1  ;;  %1551 = vadd.xlane.f32.xlu0 %v1513_v30  ;;  %v2899_v33 = vpop.f32.mrb[17].mxu0  ;;  %v1514_v34 = vmul.f32 %v4195_v29, %v4195_v29 }
 0x1d6   : > { %v2900_v35 = vadd.f32 %v2899_v33, %v2898_v31  ;;  %v3011_v36 = vpop.f32.mrb[17].mxu1  ;;  %v2901_v37 = vpop.f32.mrb[18].mxu0 }
 0x1d7   : > { %v3012_v38 = vadd.f32 %v3011_v36, %v3010_v32  ;;  %v3013_v39 = vpop.f32.mrb[18].mxu1  ;;  %1553 = vadd.xlane.f32.xlu1 %v1514_v34  ;;  %v2902_v40 = vpop.f32.mrb[19].mxu0 }
 0x1d8   : > { %v2903_v41 = vadd.f32 %v2902_v40, %v2901_v37  ;;  %v3014_v42 = vpop.f32.mrb[19].mxu1 }
 0x1d9   : > { %v4201_v43 = vadd.f32 %v3012_v38, %v2900_v35  ;;  %v3015_v46 = vadd.f32 %v3014_v42, %v3013_v39 }
 0x1db   : > { %v4203_v47 = vadd.f32 %v3015_v46, %v2903_v41  ;;  %v1515_v48 = vmul.f32 %v4201_v43, %v4201_v43 }
 0x1dc   : > { %v2904_v49 = vpop.f32.mrb[20].mxu0 }
 0x1dd   : > { %v3016_v50 = vpop.f32.mrb[20].mxu1  ;;  %1555 = vadd.xlane.f32.xlu0 %v1515_v48  ;;  %v2905_v51 = vpop.f32.mrb[21].mxu0  ;;  %v1516_v52 = vmul.f32 %v4203_v47, %v4203_v47 }
 0x1de   : > { %v2906_v53 = vadd.f32 %v2905_v51, %v2904_v49  ;;  %v3017_v54 = vpop.f32.mrb[21].mxu1  ;;  %v2907_v55 = vpop.f32.mrb[22].mxu0 }
 0x1df   : > { %v3018_v56 = vadd.f32 %v3017_v54, %v3016_v50  ;;  %v3019_v57 = vpop.f32.mrb[22].mxu1  ;;  %1557 = vadd.xlane.f32.xlu1 %v1516_v52  ;;  %v2908_v58 = vpop.f32.mrb[23].mxu0 }
 0x1e0   : > { %v2909_v59 = vadd.f32 %v2908_v58, %v2907_v55  ;;  %v3020_v62 = vpop.f32.mrb[23].mxu1 }
 0x1e1   : > { %v4209_v63 = vadd.f32 %v3018_v56, %v2906_v53  ;;  %v3021_v0 = vadd.f32 %v3020_v62, %v3019_v57 }
 0x1e3   : > { %v4211_v1 = vadd.f32 %v3021_v0, %v2909_v59  ;;  %v1517_v2 = vmul.f32 %v4209_v63, %v4209_v63 }
 0x1e4   : > { %v2910_v3 = vpop.f32.mrb[24].mxu0 }
 0x1e5   : > { %v3022_v4 = vpop.f32.mrb[24].mxu1  ;;  %1559 = vadd.xlane.f32.xlu0 %v1517_v2  ;;  %v2911_v5 = vpop.f32.mrb[25].mxu0  ;;  %v1518_v6 = vmul.f32 %v4211_v1, %v4211_v1 }
 0x1e6   : > { %v2912_v7 = vadd.f32 %v2911_v5, %v2910_v3  ;;  %v3023_v8 = vpop.f32.mrb[25].mxu1  ;;  %v2913_v9 = vpop.f32.mrb[26].mxu0 }
 0x1e7   : > { %v3024_v10 = vadd.f32 %v3023_v8, %v3022_v4  ;;  %v3025_v12 = vpop.f32.mrb[26].mxu1  ;;  %1561 = vadd.xlane.f32.xlu1 %v1518_v6  ;;  %v2914_v14 = vpop.f32.mrb[27].mxu0 }
 0x1e8   : > { %v2915_v15 = vadd.f32 %v2914_v14, %v2913_v9  ;;  %v3026_v16 = vpop.f32.mrb[27].mxu1 }
 0x1e9   : > { %v4217_v17 = vadd.f32 %v3024_v10, %v2912_v7  ;;  %v3027_v18 = vadd.f32 %v3026_v16, %v3025_v12 }
 0x1eb   : > { %v4219_v19 = vadd.f32 %v3027_v18, %v2915_v15  ;;  %v1519_v20 = vmul.f32 %v4217_v17, %v4217_v17 }
 0x1ec   : > { %v2916_v21 = vpop.f32.mrb[28].mxu0 }
 0x1ed   : > { %v3028_v22 = vpop.f32.mrb[28].mxu1  ;;  %1563 = vadd.xlane.f32.xlu0 %v1519_v20  ;;  %v2917_v23 = vpop.f32.mrb[29].mxu0  ;;  %v1520_v24 = vmul.f32 %v4219_v19, %v4219_v19 }
 0x1ee   : > { %v2918_v25 = vadd.f32 %v2917_v23, %v2916_v21  ;;  %v3029_v26 = vpop.f32.mrb[29].mxu1  ;;  %v2919_v28 = vpop.f32.mrb[30].mxu0 }
 0x1ef   : > { %v3030_v30 = vadd.f32 %v3029_v26, %v3028_v22  ;;  %v3031_v31 = vpop.f32.mrb[30].mxu1  ;;  %1565 = vadd.xlane.f32.xlu1 %v1520_v24  ;;  %v2920_v32 = vpop.f32.mrb[31].mxu0 }
 0x1f0   : > { %v2921_v33 = vadd.f32 %v2920_v32, %v2919_v28  ;;  %v3032_v34 = vpop.f32.mrb[31].mxu1 }
 0x1f1   : > { %v4225_v35 = vadd.f32 %v3030_v30, %v2918_v25  ;;  %v3033_v36 = vadd.f32 %v3032_v34, %v3031_v31 }
 0x1f3   : > { %v4227_v37 = vadd.f32 %v3033_v36, %v2921_v33  ;;  %v1521_v38 = vmul.f32 %v4225_v35, %v4225_v35 }
 0x1f4   : > { %v2922_v39 = vpop.f32.mrb[32].mxu0 }
 0x1f5   : > { %v3034_v40 = vpop.f32.mrb[32].mxu1  ;;  %1567 = vadd.xlane.f32.xlu0 %v1521_v38  ;;  %v2923_v41 = vpop.f32.mrb[33].mxu0  ;;  %v1522_v42 = vmul.f32 %v4227_v37, %v4227_v37 }
 0x1f6   : > { %v2924_v46 = vadd.f32 %v2923_v41, %v2922_v39  ;;  %v3035_v48 = vpop.f32.mrb[33].mxu1  ;;  %v2925_v49 = vpop.f32.mrb[34].mxu0 }
 0x1f7   : > { %v3036_v50 = vadd.f32 %v3035_v48, %v3034_v40  ;;  %v3037_v51 = vpop.f32.mrb[34].mxu1  ;;  %1569 = vadd.xlane.f32.xlu1 %v1522_v42  ;;  %v2926_v52 = vpop.f32.mrb[35].mxu0 }
 0x1f8   : > { %v2927_v53 = vadd.f32 %v2926_v52, %v2925_v49  ;;  %v3038_v54 = vpop.f32.mrb[35].mxu1 }
 0x1f9   : > { %v4233_v55 = vadd.f32 %v3036_v50, %v2924_v46  ;;  %v3039_v56 = vadd.f32 %v3038_v54, %v3037_v51 }
 0x1fb   : > { %v4235_v57 = vadd.f32 %v3039_v56, %v2927_v53  ;;  %v1523_v58 = vmul.f32 %v4233_v55, %v4233_v55 }
 0x1fc   : > { %v2928_v59 = vpop.f32.mrb[36].mxu0 }
 0x1fd   : > { %v3040_v62 = vpop.f32.mrb[36].mxu1  ;;  %1571 = vadd.xlane.f32.xlu0 %v1523_v58  ;;  %v2929_v0 = vpop.f32.mrb[37].mxu0  ;;  %v1524_v2 = vmul.f32 %v4235_v57, %v4235_v57 }
 0x1fe   : > { %v2930_v3 = vadd.f32 %v2929_v0, %v2928_v59  ;;  %v3041_v4 = vpop.f32.mrb[37].mxu1  ;;  %v2931_v5 = vpop.f32.mrb[38].mxu0 }
 0x1ff   : > { %v3042_v6 = vadd.f32 %v3041_v4, %v3040_v62  ;;  %v3043_v7 = vpop.f32.mrb[38].mxu1  ;;  %1573 = vadd.xlane.f32.xlu1 %v1524_v2  ;;  %v2932_v8 = vpop.f32.mrb[39].mxu0 }
 0x200   : > { %v2933_v9 = vadd.f32 %v2932_v8, %v2931_v5  ;;  %v3044_v10 = vpop.f32.mrb[39].mxu1 }
 0x201   : > { %v4241_v12 = vadd.f32 %v3042_v6, %v2930_v3  ;;  %v3045_v14 = vadd.f32 %v3044_v10, %v3043_v7 }
 0x203   : > { %v4243_v15 = vadd.f32 %v3045_v14, %v2933_v9  ;;  %v1525_v16 = vmul.f32 %v4241_v12, %v4241_v12 }
 0x204   : > { %v2934_v18 = vpop.f32.mrb[40].mxu0 }
 0x205   : > { %v3046_v20 = vpop.f32.mrb[40].mxu1  ;;  %1575 = vadd.xlane.f32.xlu0 %v1525_v16  ;;  %v2935_v21 = vpop.f32.mrb[41].mxu0  ;;  %v1526_v22 = vmul.f32 %v4243_v15, %v4243_v15 }
 0x206   : > { %v2936_v23 = vadd.f32 %v2935_v21, %v2934_v18  ;;  %v3047_v24 = vpop.f32.mrb[41].mxu1  ;;  %v2937_v25 = vpop.f32.mrb[42].mxu0 }
 0x207   : > { %v3048_v26 = vadd.f32 %v3047_v24, %v3046_v20  ;;  %v3049_v28 = vpop.f32.mrb[42].mxu1  ;;  %1577 = vadd.xlane.f32.xlu1 %v1526_v22  ;;  %v2938_v30 = vpop.f32.mrb[43].mxu0 }
 0x208   : > { %v2939_v31 = vadd.f32 %v2938_v30, %v2937_v25  ;;  %v3050_v32 = vpop.f32.mrb[43].mxu1 }
 0x209   : > { %v4249_v33 = vadd.f32 %v3048_v26, %v2936_v23  ;;  %v3051_v34 = vadd.f32 %v3050_v32, %v3049_v28 }
 0x20b   : > { %v4251_v36 = vadd.f32 %v3051_v34, %v2939_v31  ;;  %v1527_v38 = vmul.f32 %v4249_v33, %v4249_v33 }
 0x20c   : > { %v2940_v39 = vpop.f32.mrb[44].mxu0 }
 0x20d   : > { %v3052_v40 = vpop.f32.mrb[44].mxu1  ;;  %1579 = vadd.xlane.f32.xlu0 %v1527_v38  ;;  %v2941_v41 = vpop.f32.mrb[45].mxu0  ;;  %v1528_v42 = vmul.f32 %v4251_v36, %v4251_v36 }
 0x20e   : > { %v2942_v46 = vadd.f32 %v2941_v41, %v2940_v39  ;;  %v3053_v48 = vpop.f32.mrb[45].mxu1  ;;  %v2943_v49 = vpop.f32.mrb[46].mxu0 }
 0x20f   : > { %v3054_v50 = vadd.f32 %v3053_v48, %v3052_v40  ;;  %v3055_v51 = vpop.f32.mrb[46].mxu1  ;;  %1581 = vadd.xlane.f32.xlu1 %v1528_v42  ;;  %v2944_v52 = vpop.f32.mrb[47].mxu0 }
 0x210   : > { %v2945_v53 = vadd.f32 %v2944_v52, %v2943_v49  ;;  %v3056_v54 = vpop.f32.mrb[47].mxu1 }
 0x211   : > { %v4257_v56 = vadd.f32 %v3054_v50, %v2942_v46  ;;  %v3057_v58 = vadd.f32 %v3056_v54, %v3055_v51 }
 0x213   : > { %v4259_v59 = vadd.f32 %v3057_v58, %v2945_v53  ;;  %v1529_v62 = vmul.f32 %v4257_v56, %v4257_v56 }
 0x214   : > { %v2946_v0 = vpop.f32.mrb[48].mxu0 }
 0x215   : > { %v3058_v2 = vpop.f32.mrb[48].mxu1  ;;  %1583 = vadd.xlane.f32.xlu0 %v1529_v62  ;;  %v2947_v3 = vpop.f32.mrb[49].mxu0  ;;  %v1530_v4 = vmul.f32 %v4259_v59, %v4259_v59 }
 0x216   : > { %v2948_v5 = vadd.f32 %v2947_v3, %v2946_v0  ;;  %v3059_v6 = vpop.f32.mrb[49].mxu1  ;;  %v2949_v7 = vpop.f32.mrb[50].mxu0 }
 0x217   : > { %v3060_v8 = vadd.f32 %v3059_v6, %v3058_v2  ;;  %v3061_v9 = vpop.f32.mrb[50].mxu1  ;;  %1585 = vadd.xlane.f32.xlu1 %v1530_v4  ;;  %v2950_v10 = vpop.f32.mrb[51].mxu0 }
 0x218   : > { %v2951_v14 = vadd.f32 %v2950_v10, %v2949_v7  ;;  %v3062_v16 = vpop.f32.mrb[51].mxu1 }
 0x219   : > { %v4265_v18 = vadd.f32 %v3060_v8, %v2948_v5  ;;  %v3063_v20 = vadd.f32 %v3062_v16, %v3061_v9 }
 0x21b   : > { %v4267_v21 = vadd.f32 %v3063_v20, %v2951_v14  ;;  %v1531_v22 = vmul.f32 %v4265_v18, %v4265_v18 }
 0x21c   : > { %v2952_v23 = vpop.f32.mrb[52].mxu0 }
 0x21d   : > { %v3064_v24 = vpop.f32.mrb[52].mxu1  ;;  %1587 = vadd.xlane.f32.xlu0 %v1531_v22  ;;  %v2953_v25 = vpop.f32.mrb[53].mxu0  ;;  %v1532_v26 = vmul.f32 %v4267_v21, %v4267_v21 }
 0x21e   : > { %v2954_v28 = vadd.f32 %v2953_v25, %v2952_v23  ;;  %v3065_v30 = vpop.f32.mrb[53].mxu1  ;;  %v2955_v31 = vpop.f32.mrb[54].mxu0 }
 0x21f   : > { %v3066_v32 = vadd.f32 %v3065_v30, %v3064_v24  ;;  %v3067_v34 = vpop.f32.mrb[54].mxu1  ;;  %1589 = vadd.xlane.f32.xlu1 %v1532_v26  ;;  %v2956_v38 = vpop.f32.mrb[55].mxu0 }
 0x220   : > { %v2957_v39 = vadd.f32 %v2956_v38, %v2955_v31  ;;  %v3068_v40 = vpop.f32.mrb[55].mxu1 }
 0x221   : > { %v4273_v41 = vadd.f32 %v3066_v32, %v2954_v28  ;;  %v3069_v42 = vadd.f32 %v3068_v40, %v3067_v34 }
 0x223   : > { %v4275_v46 = vadd.f32 %v3069_v42, %v2957_v39  ;;  %v1533_v48 = vmul.f32 %v4273_v41, %v4273_v41 }
 0x224   : > { %v2958_v49 = vpop.f32.mrb[56].mxu0 }
 0x225   : > { %v3070_v50 = vpop.f32.mrb[56].mxu1  ;;  %1591 = vadd.xlane.f32.xlu0 %v1533_v48  ;;  %v2959_v51 = vpop.f32.mrb[57].mxu0  ;;  %v1534_v52 = vmul.f32 %v4275_v46, %v4275_v46 }
 0x226   : > { %v2960_v53 = vadd.f32 %v2959_v51, %v2958_v49  ;;  %v3071_v54 = vpop.f32.mrb[57].mxu1  ;;  %v2961_v58 = vpop.f32.mrb[58].mxu0 }
 0x227   : > { %v3072_v62 = vadd.f32 %v3071_v54, %v3070_v50  ;;  %v3073_v0 = vpop.f32.mrb[58].mxu1  ;;  %1593 = vadd.xlane.f32.xlu1 %v1534_v52  ;;  %v2962_v2 = vpop.f32.mrb[59].mxu0 }
 0x228   : > { %v2963_v3 = vadd.f32 %v2962_v2, %v2961_v58  ;;  %v3074_v4 = vpop.f32.mrb[59].mxu1 }
 0x229   : > { %v4281_v5 = vadd.f32 %v3072_v62, %v2960_v53  ;;  %v3075_v6 = vadd.f32 %v3074_v4, %v3073_v0 }
 0x22b   : > { %v4283_v7 = vadd.f32 %v3075_v6, %v2963_v3  ;;  %v1535_v8 = vmul.f32 %v4281_v5, %v4281_v5  ;;  %v4300_v3 = vld [vmem:[%s4791_s21] ss:$0 sm:$0xff]  ;;  %s4655_s21 = scalar_lea.sflag [#allocation5], %s368_s10 }
 0x22c   : > { %v2964_v9 = vpop.f32.mrb[60].mxu0 }
 0x22d   : > { %v3076_v10 = vpop.f32.mrb[60].mxu1  ;;  %1595 = vadd.xlane.f32.xlu0 %v1535_v8  ;;  %v2965_v14 = vpop.f32.mrb[61].mxu0  ;;  %v1536_v16 = vmul.f32 %v4283_v7, %v4283_v7 }
 0x22e   : > { %v2966_v20 = vadd.f32 %v2965_v14, %v2964_v9  ;;  %v3077_v22 = vpop.f32.mrb[61].mxu1  ;;  %v2967_v23 = vpop.f32.mrb[62].mxu0 }
 0x22f   : > { %v3078_v24 = vadd.f32 %v3077_v22, %v3076_v10  ;;  %v3079_v25 = vpop.f32.mrb[62].mxu1  ;;  %1597 = vadd.xlane.f32.xlu1 %v1536_v16  ;;  %v2968_v26 = vpop.f32.mrb[63].mxu0 }
 0x230   : > { %v2969_v28 = vadd.f32 %v2968_v26, %v2967_v23  ;;  %v3080_v30 = vpop.f32.mrb[63].mxu1 }
 0x231   : > { %v4289_v31 = vadd.f32 %v3078_v24, %v2966_v20  ;;  %v3081_v32 = vadd.f32 %v3080_v30, %v3079_v25 }
 0x233   : > { %v4291_v34 = vadd.f32 %v3081_v32, %v2969_v28  ;;  %v1537_v38 = vmul.f32 %v4289_v31, %v4289_v31 }
 0x235   : > { %1599 = vadd.xlane.f32.xlu0 %v1537_v38  ;;  %v1538_v39 = vmul.f32 %v4291_v34, %v4291_v34 }
 0x237   : > { %1601 = vadd.xlane.f32.xlu1 %v1538_v39 }
 0x24a   : > { %v1540_v40 = vpop.xlane.xlu0 %1539 }
 0x24b   : > { %v1604_v42 = vmul.f32 0.0078125, %v1540_v40 }
 0x24d   : > { %v1636_v48 = vadd.f32 1e-06, %v1604_v42 }
 0x24e   : > { %v1542_v49 = vpop.xlane.xlu0 %1541 }
 0x24f   : > { %3370 = vrsqrt.f32 %v1636_v48  ;;  %v1605_v50 = vmul.f32 0.0078125, %v1542_v49 }
 0x251   : > { %v1637_v51 = vadd.f32 1e-06, %v1605_v50 }
 0x252   : > { %v1544_v52 = vpop.xlane.xlu1 %1543 }
 0x253   : > { %3372 = vrsqrt.f32 %v1637_v51  ;;  %v1606_v53 = vmul.f32 0.0078125, %v1544_v52 }
 0x255   : > { %v1638_v54 = vadd.f32 1e-06, %v1606_v53 }
 0x256   : > { %v1546_v58 = vpop.xlane.xlu1 %1545 }
 0x257   : > { %3374 = vrsqrt.f32 %v1638_v54  ;;  %v1607_v62 = vmul.f32 0.0078125, %v1546_v58 }
 0x259   : > { %v3371_v0 = vpop.eup %3370  ;;  %v1639_v2 = vadd.f32 1e-06, %v1607_v62 }
 0x25a   : > { %v1548_v4 = vpop.xlane.xlu0 %1547  ;;  %v1700_v6 = vmul.f32 %v3371_v0, %v4169_v44 }
 0x25b   : > { %3376 = vrsqrt.f32 %v1639_v2  ;;  %v1608_v8 = vmul.f32 0.0078125, %v1548_v4 }
 0x25c   : > { %v1550_v9 = vpop.xlane.xlu1 %1549  ;;  %v4304_v10 = vmul.f32 %v4300_v3, %v1700_v6 }
 0x25d   : > { %v3373_v14 = vpop.eup %3372  ;;  %v1640_v16 = vadd.f32 1e-06, %v1608_v8  ;;  %v1609_v20 = vmul.f32 0.0078125, %v1550_v9 }
 0x25e   : > { %1963 = vrot.lane.b32.xlu0 %v4304_v10, %s3720_s17  ;;  %v1701_v22 = vmul.f32 %v3373_v14, %v4171_v45  ;;  %v1771_v24 = vsub.f32 0.0, %v4304_v10 }
 0x25f   : > { %3378 = vrsqrt.f32 %v1640_v16  ;;  %v1641_v23 = vadd.f32 1e-06, %v1609_v20 }
 0x260   : > { %v4311_v44 = vmul.f32 %v4300_v3, %v1701_v22 }
 0x261   : > { %v3375_v25 = vpop.eup %3374  ;;  %3380 = vrsqrt.f32 %v1641_v23 }
 0x262   : > { %1835 = vrot.lane.b32.xlu0 %v1771_v24, %s3720_s17  ;;  %1965 = vrot.lane.b32.xlu1 %v4311_v44, %s3720_s17  ;;  %v1552_v26 = vpop.xlane.xlu0 %1551  ;;  %v1702_v28 = vmul.f32 %v3375_v25, %v4177_v60  ;;  %v1772_v38 = vsub.f32 0.0, %v4311_v44 }
 0x263   : > { %v1610_v30 = vmul.f32 0.0078125, %v1552_v26 }
 0x264   : > { %v1554_v32 = vpop.xlane.xlu1 %1553  ;;  %v4318_v45 = vmul.f32 %v4300_v3, %v1702_v28 }
 0x265   : > { %v3377_v39 = vpop.eup %3376  ;;  %v1642_v40 = vadd.f32 1e-06, %v1610_v30  ;;  %v1611_v42 = vmul.f32 0.0078125, %v1554_v32 }
 0x266   : > { %1967 = vrot.lane.b32.xlu0 %v4318_v45, %s3720_s17  ;;  %1837 = vrot.lane.b32.xlu1 %v1772_v38, %s3720_s17  ;;  %v1773_v60 = vsub.f32 0.0, %v4318_v45  ;;  %v1703_v49 = vmul.f32 %v3377_v39, %v4179_v61 }
 0x267   : > { %3382 = vrsqrt.f32 %v1642_v40  ;;  %v1643_v48 = vadd.f32 1e-06, %v1611_v42 }
 0x268   : > { %v4329_v58 = vmul.f32 %v4300_v3, %v1703_v49 }
 0x269   : > { %v3379_v50 = vpop.eup %3378  ;;  %3384 = vrsqrt.f32 %v1643_v48 }
 0x26a   : > { %1839 = vrot.lane.b32.xlu1 %v1773_v60, %s3720_s17  ;;  %v1556_v51 = vpop.xlane.xlu0 %1555  ;;  %v1704_v52 = vmul.f32 %v3379_v50, %v4185_v11  ;;  %v1774_v11 = vsub.f32 0.0, %v4329_v58 }
 0x26b   : > { %v1612_v53 = vmul.f32 0.0078125, %v1556_v51  ;;  %v3381_v0 = vpop.eup %3380 }
 0x26c   : > { %v1558_v54 = vpop.xlane.xlu1 %1557  ;;  %v4332_v62 = vmul.f32 %v4300_v3, %v1704_v52  ;;  %v1705_v8 = vmul.f32 %v3381_v0, %v4187_v13 }
 0x26d   : > { %v1644_v2 = vadd.f32 1e-06, %v1612_v53  ;;  %v1613_v4 = vmul.f32 0.0078125, %v1558_v54 }
 0x26e   : > { %1969 = vrot.lane.b32.xlu1 %v4329_v58, %s3720_s17  ;;  %1971 = vrot.lane.b32.xlu0 %v4332_v62, %s3720_s17  ;;  %v1775_v6 = vsub.f32 0.0, %v4332_v62  ;;  %v4345_v23 = vmul.f32 %v4300_v3, %v1705_v8 }
 0x26f   : > { %3386 = vrsqrt.f32 %v1644_v2  ;;  %v1645_v61 = vadd.f32 1e-06, %v1613_v4 }
 0x270   : > { %v1776_v28 = vsub.f32 0.0, %v4345_v23 }
 0x271   : > { %v3383_v9 = vpop.eup %3382  ;;  %3388 = vrsqrt.f32 %v1645_v61 }
 0x272   : > { %1841 = vrot.lane.b32.xlu1 %v1774_v11, %s3720_s17  ;;  %1843 = vrot.lane.b32.xlu0 %v1775_v6, %s3720_s17  ;;  %v1560_v14 = vpop.xlane.xlu0 %1559  ;;  %v1706_v16 = vmul.f32 %v3383_v9, %v4193_v27 }
 0x273   : > { %v1614_v20 = vmul.f32 0.0078125, %v1560_v14  ;;  %v3385_v25 = vpop.eup %3384 }
 0x274   : > { %v1562_v22 = vpop.xlane.xlu1 %1561  ;;  %v4348_v24 = vmul.f32 %v4300_v3, %v1706_v16  ;;  %v1707_v32 = vmul.f32 %v3385_v25, %v4195_v29 }
 0x275   : > { %v1646_v26 = vadd.f32 1e-06, %v1614_v20  ;;  %v1615_v13 = vmul.f32 0.0078125, %v1562_v22 }
 0x276   : > { %1973 = vrot.lane.b32.xlu1 %v4345_v23, %s3720_s17  ;;  %1975 = vrot.lane.b32.xlu0 %v4348_v24, %s3720_s17  ;;  %v1777_v30 = vsub.f32 0.0, %v4348_v24  ;;  %v4361_v60 = vmul.f32 %v4300_v3, %v1707_v32 }
 0x277   : > { %3390 = vrsqrt.f32 %v1646_v26  ;;  %v1647_v27 = vadd.f32 1e-06, %v1615_v13 }
 0x278   : > { %v1778_v52 = vsub.f32 0.0, %v4361_v60 }
 0x279   : > { %v3387_v38 = vpop.eup %3386  ;;  %3392 = vrsqrt.f32 %v1647_v27 }
 0x27a   : > { %1845 = vrot.lane.b32.xlu1 %v1776_v28, %s3720_s17  ;;  %1847 = vrot.lane.b32.xlu0 %v1777_v30, %s3720_s17  ;;  %v1564_v39 = vpop.xlane.xlu0 %1563  ;;  %v1708_v40 = vmul.f32 %v3387_v38, %v4201_v43 }
 0x27b   : > { %v1616_v42 = vmul.f32 0.0078125, %v1564_v39  ;;  %v3389_v50 = vpop.eup %3388 }
 0x27c   : > { %v1566_v48 = vpop.xlane.xlu1 %1565  ;;  %v4364_v49 = vmul.f32 %v4300_v3, %v1708_v40  ;;  %v1709_v54 = vmul.f32 %v3389_v50, %v4203_v47 }
 0x27d   : > { %v1648_v51 = vadd.f32 1e-06, %v1616_v42  ;;  %v1617_v29 = vmul.f32 0.0078125, %v1566_v48 }
 0x27e   : > { %1977 = vrot.lane.b32.xlu1 %v4361_v60, %s3720_s17  ;;  %1979 = vrot.lane.b32.xlu0 %v4364_v49, %s3720_s17  ;;  %v1779_v53 = vsub.f32 0.0, %v4364_v49  ;;  %v4377_v6 = vmul.f32 %v4300_v3, %v1709_v54 }
 0x27f   : > { %3394 = vrsqrt.f32 %v1648_v51  ;;  %v1649_v43 = vadd.f32 1e-06, %v1617_v29 }
 0x280   : > { %v1780_v16 = vsub.f32 0.0, %v4377_v6 }
 0x281   : > { %v3391_v0 = vpop.eup %3390  ;;  %3396 = vrsqrt.f32 %v1649_v43 }
 0x282   : > { %1849 = vrot.lane.b32.xlu1 %v1778_v52, %s3720_s17  ;;  %1851 = vrot.lane.b32.xlu0 %v1779_v53, %s3720_s17  ;;  %v1568_v2 = vpop.xlane.xlu0 %1567  ;;  %v1710_v4 = vmul.f32 %v3391_v0, %v4209_v63 }
 0x283   : > { %v1618_v61 = vmul.f32 0.0078125, %v1568_v2  ;;  %v3393_v9 = vpop.eup %3392 }
 0x284   : > { %v1570_v11 = vpop.xlane.xlu1 %1569  ;;  %v4380_v8 = vmul.f32 %v4300_v3, %v1710_v4  ;;  %v1711_v22 = vmul.f32 %v3393_v9, %v4211_v1 }
 0x285   : > { %v1650_v14 = vadd.f32 1e-06, %v1618_v61  ;;  %v1619_v47 = vmul.f32 0.0078125, %v1570_v11 }
 0x286   : > { %1981 = vrot.lane.b32.xlu1 %v4377_v6, %s3720_s17  ;;  %1983 = vrot.lane.b32.xlu0 %v4380_v8, %s3720_s17  ;;  %v1781_v20 = vsub.f32 0.0, %v4380_v8  ;;  %v4393_v30 = vmul.f32 %v4300_v3, %v1711_v22 }
 0x287   : > { %3398 = vrsqrt.f32 %v1650_v14  ;;  %v1651_v63 = vadd.f32 1e-06, %v1619_v47 }
 0x288   : > { %v1782_v40 = vsub.f32 0.0, %v4393_v30 }
 0x289   : > { %v3395_v25 = vpop.eup %3394  ;;  %3400 = vrsqrt.f32 %v1651_v63 }
 0x28a   : > { %1853 = vrot.lane.b32.xlu1 %v1780_v16, %s3720_s17  ;;  %1855 = vrot.lane.b32.xlu0 %v1781_v20, %s3720_s17  ;;  %v1572_v26 = vpop.xlane.xlu0 %1571  ;;  %v1712_v13 = vmul.f32 %v3395_v25, %v4217_v17 }
 0x28b   : > { %v1620_v27 = vmul.f32 0.0078125, %v1572_v26  ;;  %v3397_v38 = vpop.eup %3396 }
 0x28c   : > { %v1574_v28 = vpop.xlane.xlu1 %1573  ;;  %v4396_v32 = vmul.f32 %v4300_v3, %v1712_v13  ;;  %v1713_v48 = vmul.f32 %v3397_v38, %v4219_v19 }
 0x28d   : > { %v1652_v39 = vadd.f32 1e-06, %v1620_v27  ;;  %v1621_v1 = vmul.f32 0.0078125, %v1574_v28 }
 0x28e   : > { %1985 = vrot.lane.b32.xlu1 %v4393_v30, %s3720_s17  ;;  %1987 = vrot.lane.b32.xlu0 %v4396_v32, %s3720_s17  ;;  %v1783_v42 = vsub.f32 0.0, %v4396_v32  ;;  %v4409_v53 = vmul.f32 %v4300_v3, %v1713_v48 }
 0x28f   : > { %3402 = vrsqrt.f32 %v1652_v39  ;;  %v1653_v17 = vadd.f32 1e-06, %v1621_v1 }
 0x290   : > { %v1784_v4 = vsub.f32 0.0, %v4409_v53 }
 0x291   : > { %v3399_v50 = vpop.eup %3398  ;;  %3404 = vrsqrt.f32 %v1653_v17 }
 0x292   : > { %1857 = vrot.lane.b32.xlu1 %v1782_v40, %s3720_s17  ;;  %1859 = vrot.lane.b32.xlu0 %v1783_v42, %s3720_s17  ;;  %v1576_v51 = vpop.xlane.xlu0 %1575  ;;  %v1714_v29 = vmul.f32 %v3399_v50, %v4225_v35 }
 0x293   : > { %v1622_v43 = vmul.f32 0.0078125, %v1576_v51  ;;  %v3401_v0 = vpop.eup %3400 }
 0x294   : > { %v1578_v52 = vpop.xlane.xlu1 %1577  ;;  %v4412_v54 = vmul.f32 %v4300_v3, %v1714_v29  ;;  %v1715_v11 = vmul.f32 %v3401_v0, %v4227_v37 }
 0x295   : > { %v1654_v2 = vadd.f32 1e-06, %v1622_v43  ;;  %v1623_v19 = vmul.f32 0.0078125, %v1578_v52 }
 0x296   : > { %1989 = vrot.lane.b32.xlu1 %v4409_v53, %s3720_s17  ;;  %1991 = vrot.lane.b32.xlu0 %v4412_v54, %s3720_s17  ;;  %v1785_v61 = vsub.f32 0.0, %v4412_v54  ;;  %v4425_v20 = vmul.f32 %v4300_v3, %v1715_v11 }
 0x297   : > { %3406 = vrsqrt.f32 %v1654_v2  ;;  %v1655_v35 = vadd.f32 1e-06, %v1623_v19 }
 0x298   : > { %v1786_v13 = vsub.f32 0.0, %v4425_v20 }
 0x299   : > { %v3403_v9 = vpop.eup %3402  ;;  %3408 = vrsqrt.f32 %v1655_v35 }
 0x29a   : > { %1861 = vrot.lane.b32.xlu1 %v1784_v4, %s3720_s17  ;;  %1863 = vrot.lane.b32.xlu0 %v1785_v61, %s3720_s17  ;;  %v1580_v14 = vpop.xlane.xlu0 %1579  ;;  %v1716_v47 = vmul.f32 %v3403_v9, %v4233_v55 }
 0x29b   : > { %v1624_v63 = vmul.f32 0.0078125, %v1580_v14  ;;  %v3405_v25 = vpop.eup %3404 }
 0x29c   : > { %v1582_v16 = vpop.xlane.xlu1 %1581  ;;  %v4428_v22 = vmul.f32 %v4300_v3, %v1716_v47  ;;  %v1717_v28 = vmul.f32 %v3405_v25, %v4235_v57 }
 0x29d   : > { %v1656_v26 = vadd.f32 1e-06, %v1624_v63  ;;  %v1625_v37 = vmul.f32 0.0078125, %v1582_v16 }
 0x29e   : > { %1993 = vrot.lane.b32.xlu1 %v4425_v20, %s3720_s17  ;;  %1995 = vrot.lane.b32.xlu0 %v4428_v22, %s3720_s17  ;;  %v1787_v27 = vsub.f32 0.0, %v4428_v22  ;;  %v4441_v42 = vmul.f32 %v4300_v3, %v1717_v28 }
 0x29f   : > { %3410 = vrsqrt.f32 %v1656_v26  ;;  %v1657_v55 = vadd.f32 1e-06, %v1625_v37 }
 0x2a0   : > { %v1788_v29 = vsub.f32 0.0, %v4441_v42 }
 0x2a1   : > { %v3407_v38 = vpop.eup %3406  ;;  %3412 = vrsqrt.f32 %v1657_v55 }
 0x2a2   : > { %1865 = vrot.lane.b32.xlu1 %v1786_v13, %s3720_s17  ;;  %1867 = vrot.lane.b32.xlu0 %v1787_v27, %s3720_s17  ;;  %v1584_v39 = vpop.xlane.xlu0 %1583  ;;  %v1718_v1 = vmul.f32 %v3407_v38, %v4241_v12 }
 0x2a3   : > { %v1626_v17 = vmul.f32 0.0078125, %v1584_v39  ;;  %v3409_v50 = vpop.eup %3408 }
 0x2a4   : > { %v1586_v40 = vpop.xlane.xlu1 %1585  ;;  %v4444_v48 = vmul.f32 %v4300_v3, %v1718_v1  ;;  %v1719_v52 = vmul.f32 %v3409_v50, %v4243_v15 }
 0x2a5   : > { %v1658_v51 = vadd.f32 1e-06, %v1626_v17  ;;  %v1627_v57 = vmul.f32 0.0078125, %v1586_v40 }
 0x2a6   : > { %1997 = vrot.lane.b32.xlu1 %v4441_v42, %s3720_s17  ;;  %1999 = vrot.lane.b32.xlu0 %v4444_v48, %s3720_s17  ;;  %v1789_v43 = vsub.f32 0.0, %v4444_v48  ;;  %v4457_v61 = vmul.f32 %v4300_v3, %v1719_v52 }
 0x2a7   : > { %3414 = vrsqrt.f32 %v1658_v51  ;;  %v1659_v12 = vadd.f32 1e-06, %v1627_v57 }
 0x2a8   : > { %v1790_v47 = vsub.f32 0.0, %v4457_v61 }
 0x2a9   : > { %v3411_v0 = vpop.eup %3410  ;;  %3416 = vrsqrt.f32 %v1659_v12 }
 0x2aa   : > { %1869 = vrot.lane.b32.xlu1 %v1788_v29, %s3720_s17  ;;  %1871 = vrot.lane.b32.xlu0 %v1789_v43, %s3720_s17  ;;  %v1588_v2 = vpop.xlane.xlu0 %1587  ;;  %v1720_v19 = vmul.f32 %v3411_v0, %v4249_v33 }
 0x2ab   : > { %v1628_v35 = vmul.f32 0.0078125, %v1588_v2  ;;  %v3413_v9 = vpop.eup %3412 }
 0x2ac   : > { %v1590_v4 = vpop.xlane.xlu1 %1589  ;;  %v4460_v11 = vmul.f32 %v4300_v3, %v1720_v19  ;;  %v1721_v16 = vmul.f32 %v3413_v9, %v4251_v36 }
 0x2ad   : > { %v1660_v14 = vadd.f32 1e-06, %v1628_v35  ;;  %v1629_v15 = vmul.f32 0.0078125, %v1590_v4 }
 0x2ae   : > { %2001 = vrot.lane.b32.xlu1 %v4457_v61, %s3720_s17  ;;  %2003 = vrot.lane.b32.xlu0 %v4460_v11, %s3720_s17  ;;  %v1791_v63 = vsub.f32 0.0, %v4460_v11  ;;  %v4473_v27 = vmul.f32 %v4300_v3, %v1721_v16 }
 0x2af   : > { %3418 = vrsqrt.f32 %v1660_v14  ;;  %v1661_v33 = vadd.f32 1e-06, %v1629_v15 }
 0x2b0   : > { %v1792_v1 = vsub.f32 0.0, %v4473_v27 }
 0x2b1   : > { %v3415_v25 = vpop.eup %3414  ;;  %3420 = vrsqrt.f32 %v1661_v33 }
 0x2b2   : > { %1873 = vrot.lane.b32.xlu1 %v1790_v47, %s3720_s17  ;;  %1875 = vrot.lane.b32.xlu0 %v1791_v63, %s3720_s17  ;;  %v1592_v26 = vpop.xlane.xlu0 %1591  ;;  %v1722_v37 = vmul.f32 %v3415_v25, %v4257_v56 }
 0x2b3   : > { %v1630_v55 = vmul.f32 0.0078125, %v1592_v26  ;;  %v3417_v38 = vpop.eup %3416 }
 0x2b4   : > { %v1594_v13 = vpop.xlane.xlu1 %1593  ;;  %v4476_v28 = vmul.f32 %v4300_v3, %v1722_v37  ;;  %v1723_v40 = vmul.f32 %v3417_v38, %v4259_v59 }
 0x2b5   : > { %v1662_v39 = vadd.f32 1e-06, %v1630_v55  ;;  %v1631_v36 = vmul.f32 0.0078125, %v1594_v13 }
 0x2b6   : > { %2005 = vrot.lane.b32.xlu1 %v4473_v27, %s3720_s17  ;;  %2007 = vrot.lane.b32.xlu0 %v4476_v28, %s3720_s17  ;;  %v1793_v17 = vsub.f32 0.0, %v4476_v28  ;;  %v4489_v43 = vmul.f32 %v4300_v3, %v1723_v40 }
 0x2b7   : > { %3422 = vrsqrt.f32 %v1662_v39  ;;  %v1663_v56 = vadd.f32 1e-06, %v1631_v36 }
 0x2b8   : > { %v1794_v19 = vsub.f32 0.0, %v4489_v43 }
 0x2b9   : > { %v3419_v50 = vpop.eup %3418  ;;  %3424 = vrsqrt.f32 %v1663_v56 }
 0x2ba   : > { %1877 = vrot.lane.b32.xlu1 %v1792_v1, %s3720_s17  ;;  %1879 = vrot.lane.b32.xlu0 %v1793_v17, %s3720_s17  ;;  %v1596_v51 = vpop.xlane.xlu0 %1595  ;;  %v1724_v57 = vmul.f32 %v3419_v50, %v4265_v18 }
 0x2bb   : > { %v1632_v12 = vmul.f32 0.0078125, %v1596_v51  ;;  %v3421_v0 = vpop.eup %3420 }
 0x2bc   : > { %v1598_v29 = vpop.xlane.xlu1 %1597  ;;  %v4492_v52 = vmul.f32 %v4300_v3, %v1724_v57  ;;  %v1725_v4 = vmul.f32 %v3421_v0, %v4267_v21 }
 0x2bd   : > { %v1664_v2 = vadd.f32 1e-06, %v1632_v12  ;;  %v1633_v59 = vmul.f32 0.0078125, %v1598_v29 }
 0x2be   : > { %2009 = vrot.lane.b32.xlu1 %v4489_v43, %s3720_s17  ;;  %2011 = vrot.lane.b32.xlu0 %v4492_v52, %s3720_s17  ;;  %v1795_v35 = vsub.f32 0.0, %v4492_v52  ;;  %v4505_v63 = vmul.f32 %v4300_v3, %v1725_v4  ;;  %v2157_v4 = vld [vmem:[#allocation9 + $0x8] sm:$0xff] }
 0x2bf   : > { %3426 = vrsqrt.f32 %v1664_v2  ;;  %v1665_v18 = vadd.f32 1e-06, %v1633_v59  ;;  %v2156_v59 = vld [vmem:[#allocation9] sm:$0xff] }
 0x2c0   : > { %v1796_v37 = vsub.f32 0.0, %v4505_v63 }
 0x2c1   : > { %v3423_v9 = vpop.eup %3422  ;;  %3428 = vrsqrt.f32 %v1665_v18 }
 0x2c2   : > { %1881 = vrot.lane.b32.xlu1 %v1794_v19, %s3720_s17  ;;  %1883 = vrot.lane.b32.xlu0 %v1795_v35, %s3720_s17  ;;  %v1600_v14 = vpop.xlane.xlu0 %1599  ;;  %v1726_v15 = vmul.f32 %v3423_v9, %v4273_v41  ;;  %v2092_v19 = vld [vmem:[#allocation8] sm:$0xff]  ;;  %v2093_v35 = vld [vmem:[#allocation8 + $0x8] sm:$0xff] }
 0x2c3   : > { %v1634_v33 = vmul.f32 0.0078125, %v1600_v14  ;;  %v3425_v25 = vpop.eup %3424 }
 0x2c4   : > { %v1602_v47 = vpop.xlane.xlu1 %1601  ;;  %v4508_v16 = vmul.f32 %v4300_v3, %v1726_v15  ;;  %v1727_v13 = vmul.f32 %v3425_v25, %v4275_v46  ;;  %v2125_v25 = vmul.f32 %v2093_v35, %v4311_v44 }
 0x2c5   : > { %v1666_v26 = vadd.f32 1e-06, %v1634_v33  ;;  %v1635_v21 = vmul.f32 0.0078125, %v1602_v47  ;;  %v2124_v47 = vmul.f32 %v2092_v19, %v4304_v10  ;;  %v2160_v19 = vld [vmem:[#allocation9 + $0x20] sm:$0xff] }
 0x2c6   : > { %2013 = vrot.lane.b32.xlu1 %v4505_v63, %s3720_s17  ;;  %2015 = vrot.lane.b32.xlu0 %v4508_v16, %s3720_s17  ;;  %v1797_v55 = vsub.f32 0.0, %v4508_v16  ;;  %v4521_v36 = vmul.f32 %v4300_v3, %v1727_v13 }
 0x2c7   : > { %3430 = vrsqrt.f32 %v1666_v26  ;;  %v1667_v41 = vadd.f32 1e-06, %v1635_v21 }
 0x2c8   : > { %v1798_v17 = vsub.f32 0.0, %v4521_v36 }
 0x2c9   : > { %v3427_v38 = vpop.eup %3426  ;;  %3432 = vrsqrt.f32 %v1667_v41 }
 0x2ca   : > { %1885 = vrot.lane.b32.xlu1 %v1796_v37, %s3720_s17  ;;  %1887 = vrot.lane.b32.xlu0 %v1797_v55, %s3720_s17  ;;  %v1728_v39 = vmul.f32 %v3427_v38, %v4281_v5  ;;  %v2158_v38 = vld [vmem:[#allocation9 + $0x10] sm:$0xff] }
 0x2cb   : > { %v3429_v1 = vpop.eup %3428 }
 0x2cc   : > { %v4524_v56 = vmul.f32 %v4300_v3, %v1728_v39  ;;  %v1729_v5 = vmul.f32 %v3429_v1, %v4283_v7  ;;  %v2094_v1 = vld [vmem:[#allocation8 + $0x10] sm:$0xff] }
 0x2ce   : > { %2017 = vrot.lane.b32.xlu1 %v4521_v36, %s3720_s17  ;;  %2019 = vrot.lane.b32.xlu0 %v4524_v56, %s3720_s17  ;;  %v1799_v40 = vsub.f32 0.0, %v4524_v56  ;;  %v4537_v0 = vmul.f32 %v4300_v3, %v1729_v5 }
 0x2d0   : > { %v1964_v46 = vpop.permute.xlu0 %1963  ;;  %v1800_v15 = vsub.f32 0.0, %v4537_v0 }
 0x2d1   : > { %v3431_v50 = vpop.eup %3430 }
 0x2d2   : > { %1889 = vrot.lane.b32.xlu1 %v1798_v17, %s3720_s17  ;;  %1891 = vrot.lane.b32.xlu0 %v1799_v40, %s3720_s17  ;;  %v1730_v51 = vmul.f32 %v3431_v50, %v4289_v31  ;;  %v2159_v17 = vld [vmem:[#allocation9 + $0x18] sm:$0xff] }
 0x2d3   : > { %v3433_v57 = vpop.eup %3432 }
 0x2d4   : > { %v1966_v12 = vpop.permute.xlu1 %1965  ;;  %v1836_v29 = vpop.permute.xlu0 %1835  ;;  %v4540_v2 = vmul.f32 %v4300_v3, %v1730_v51  ;;  %v1731_v7 = vmul.f32 %v3433_v57, %v4291_v34  ;;  %v2126_v57 = vmul.f32 %v2094_v1, %v4318_v45  ;;  %v2163_v1 = vld [vmem:[#allocation9 + $0x38] sm:$0xff] }
 0x2d5   : > { %v2060_v18 = vsel %vm2059_vm0, %v1836_v29, %v1964_v46  ;;  %v2095_v46 = vld [vmem:[#allocation8 + $0x18] sm:$0xff] }
 0x2d6   : > { %2021 = vrot.lane.b32.xlu1 %v4537_v0, %s3720_s17  ;;  %v1801_v31 = vsub.f32 0.0, %v4540_v2  ;;  %v2188_v9 = vmul.f32 %v2156_v59, %v2060_v18  ;;  %v4551_v34 = vmul.f32 %v4300_v3, %v1731_v7 }
 0x2d8   : > { %v1838_v14 = vpop.permute.xlu1 %1837  ;;  %1895 = vrot.lane.b32.xlu0 %v1801_v31, %s3720_s17  ;;  %v2220_v21 = vadd.f32 %v2188_v9, %v2124_v47  ;;  %v1968_v37 = vpop.permute.xlu0 %1967  ;;  %v1802_v3 = vsub.f32 0.0, %v4551_v34  ;;  %v2096_v9 = vld [vmem:[#allocation8 + $0x20] sm:$0xff] }
 0x2d9   : > { %v2061_v33 = vsel %vm2059_vm0, %v1838_v14, %v1966_v12  ;;  %v2127_v12 = vmul.f32 %v2095_v46, %v4329_v58  ;;  %v2097_v14 = vld [vmem:[#allocation8 + $0x28] sm:$0xff]  ;;  %v2128_v58 = vmul.f32 %v2096_v9, %v4332_v62 }
 0x2da   : > { %v2189_v26 = vmul.f32 %v2157_v4, %v2061_v33  ;;  %1893 = vrot.lane.b32.xlu1 %v1800_v15, %s3720_s17  ;;  %v2161_v15 = vld [vmem:[#allocation9 + $0x28] sm:$0xff] }
 0x2dc   : > { %v2221_v41 = vadd.f32 %v2189_v26, %v2125_v25  ;;  %v1840_v55 = vpop.permute.xlu1 %1839  ;;  %2023 = vrot.lane.b32.xlu0 %v4540_v2, %s3720_s17  ;;  %v2129_v26 = vmul.f32 %v2097_v14, %v4345_v23 }
 0x2dd   : > { %v2062_v39 = vsel %vm2059_vm0, %v1840_v55, %v1968_v37 }
 0x2de   : > { %v2766_v13 = vpack.c.bf16 %v2221_v41, %v2220_v21  ;;  %1897 = vrot.lane.b32.xlu1 %v1802_v3, %s3720_s17  ;;  %v2190_v40 = vmul.f32 %v2158_v38, %v2062_v39  ;;  %v2098_v38 = vld [vmem:[#allocation8 + $0x30] sm:$0xff]  ;;  %v2099_v39 = vld [vmem:[#allocation8 + $0x38] sm:$0xff] }
 0x2df   : > { %v2130_v23 = vmul.f32 %v2098_v38, %v4348_v24 }
 0x2e0   : > { %2767 = vst [vmem:[%s4563_s8] sm:$0xff] %v2766_v13   ;;  %v1970_v10 = vpop.permute.xlu1 %1969  ;;  %v1972_v44 = vpop.permute.xlu0 %1971  ;;  %v2222_v7 = vadd.f32 %v2190_v40, %v2126_v57  ;;  %v2162_v13 = vld [vmem:[#allocation9 + $0x30] sm:$0xff] }
 0x2e2   : > { %2025 = vrot.lane.b32.xlu1 %v4551_v34, %s3720_s17 }
 0x2e4   : > { %v1842_v5 = vpop.permute.xlu1 %1841  ;;  %v1844_v50 = vpop.permute.xlu0 %1843 }
 0x2e5   : > { %v2063_v51 = vsel %vm2059_vm0, %v1842_v5, %v1970_v10  ;;  %v2064_v35 = vsel %vm2059_vm0, %v1844_v50, %v1972_v44  ;;  %v2131_v5 = vmul.f32 %v2099_v39, %v4361_v60 }
 0x2e6   : > { %v2191_v29 = vmul.f32 %v2159_v17, %v2063_v51  ;;  %v2192_v33 = vmul.f32 %v2160_v19, %v2064_v35  ;;  %v2101_v19 = vld [vmem:[#allocation8 + $0x48] sm:$0xff] }
 0x2e7   : > { %v2165_v35 = vld [vmem:[#allocation9 + $0x48] sm:$0xff] }
 0x2e8   : > { %v2223_v59 = vadd.f32 %v2191_v29, %v2127_v12  ;;  %v1974_v18 = vpop.permute.xlu1 %1973  ;;  %v1976_v31 = vpop.permute.xlu0 %1975  ;;  %v2224_v41 = vadd.f32 %v2192_v33, %v2128_v58 }
 0x2ea   : > { %v2771_v4 = vpack.c.bf16 %v2223_v59, %v2222_v7  ;;  %v2164_v7 = vld [vmem:[#allocation9 + $0x40] sm:$0xff] }
 0x2ec   : > { %2843 = vst [vmem:[%s4563_s8 + $0x8] sm:$0xff] %v2771_v4   ;;  %v1846_v47 = vpop.permute.xlu1 %1845  ;;  %v1848_v25 = vpop.permute.xlu0 %1847 }
 0x2ed   : > { %v2065_v45 = vsel %vm2059_vm0, %v1846_v47, %v1974_v18  ;;  %v2066_v10 = vsel %vm2059_vm0, %v1848_v25, %v1976_v31  ;;  %v2100_v31 = vld [vmem:[#allocation8 + $0x40] sm:$0xff] }
 0x2ee   : > { %v2193_v21 = vmul.f32 %v2161_v15, %v2065_v45  ;;  %v2194_v46 = vmul.f32 %v2162_v13, %v2066_v10  ;;  %v2132_v60 = vmul.f32 %v2100_v31, %v4364_v49  ;;  %v2133_v15 = vmul.f32 %v2101_v19, %v4377_v6 }
 0x2f0   : > { %v2225_v37 = vadd.f32 %v2193_v21, %v2129_v26  ;;  %v1978_v55 = vpop.permute.xlu1 %1977  ;;  %v1980_v3 = vpop.permute.xlu0 %1979  ;;  %v2226_v51 = vadd.f32 %v2194_v46, %v2130_v23  ;;  %v2166_v26 = vld [vmem:[#allocation9 + $0x50] sm:$0xff] }
 0x2f2   : > { %v2776_v44 = vpack.c.bf16 %v2225_v37, %v2224_v41  ;;  %v2102_v37 = vld [vmem:[#allocation8 + $0x50] sm:$0xff] }
 0x2f3   : > { %v2134_v6 = vmul.f32 %v2102_v37, %v4380_v8 }
 0x2f4   : > { %2844 = vst [vmem:[%s4563_s8 + $0x10] sm:$0xff] %v2776_v44   ;;  %v1850_v17 = vpop.permute.xlu1 %1849  ;;  %v1852_v40 = vpop.permute.xlu0 %1851 }
 0x2f5   : > { %v2067_v62 = vsel %vm2059_vm0, %v1850_v17, %v1978_v55  ;;  %v2068_v59 = vsel %vm2059_vm0, %v1852_v40, %v1980_v3  ;;  %v2103_v55 = vld [vmem:[#allocation8 + $0x58] sm:$0xff] }
 0x2f6   : > { %v2195_v50 = vmul.f32 %v2163_v1, %v2067_v62  ;;  %v2196_v4 = vmul.f32 %v2164_v7, %v2068_v59  ;;  %v2167_v3 = vld [vmem:[#allocation9 + $0x58] sm:$0xff]  ;;  %v2135_v38 = vmul.f32 %v2103_v55, %v4393_v30  ;;  %v2168_v62 = vld [vmem:[#allocation9 + $0x60] sm:$0xff] }
 0x2f8   : > { %v2227_v57 = vadd.f32 %v2195_v50, %v2131_v5  ;;  %v1982_v12 = vpop.permute.xlu1 %1981  ;;  %v1984_v29 = vpop.permute.xlu0 %1983  ;;  %v2228_v47 = vadd.f32 %v2196_v4, %v2132_v60  ;;  %v2104_v50 = vld [vmem:[#allocation8 + $0x60] sm:$0xff]  ;;  %v2106_v60 = vld [vmem:[#allocation8 + $0x70] sm:$0xff] }
 0x2f9   : > { %v2136_v30 = vmul.f32 %v2104_v50, %v4396_v32  ;;  %v2174_v50 = vld [vmem:[#allocation9 + $0x90] sm:$0xff] }
 0x2fa   : > { %v2781_v18 = vpack.c.bf16 %v2227_v57, %v2226_v51  ;;  %v2105_v51 = vld [vmem:[#allocation8 + $0x68] sm:$0xff] }
 0x2fb   : > { %v2169_v57 = vld [vmem:[#allocation9 + $0x68] sm:$0xff]  ;;  %v2137_v59 = vmul.f32 %v2105_v51, %v4409_v53  ;;  %v2138_v53 = vmul.f32 %v2106_v60, %v4412_v54 }
 0x2fc   : > { %2845 = vst [vmem:[%s4563_s8 + $0x18] sm:$0xff] %v2781_v18   ;;  %v1854_v9 = vpop.permute.xlu1 %1853  ;;  %v1856_v14 = vpop.permute.xlu0 %1855 }
 0x2fd   : > { %v2069_v24 = vsel %vm2059_vm0, %v1854_v9, %v1982_v12  ;;  %v2070_v21 = vsel %vm2059_vm0, %v1856_v14, %v1984_v29  ;;  %v2170_v9 = vld [vmem:[#allocation9 + $0x70] sm:$0xff] }
 0x2fe   : > { %v2197_v33 = vmul.f32 %v2165_v35, %v2069_v24  ;;  %v2198_v13 = vmul.f32 %v2166_v26, %v2070_v21 }
 0x300   : > { %v2229_v25 = vadd.f32 %v2197_v33, %v2133_v15  ;;  %v1986_v45 = vpop.permute.xlu1 %1985  ;;  %v1988_v58 = vpop.permute.xlu0 %1987  ;;  %v2230_v1 = vadd.f32 %v2198_v13, %v2134_v6  ;;  %v2107_v15 = vld [vmem:[#allocation8 + $0x78] sm:$0xff]  ;;  %v2173_v6 = vld [vmem:[#allocation9 + $0x88] sm:$0xff] }
 0x301   : > { %v2171_v33 = vld [vmem:[#allocation9 + $0x78] sm:$0xff] }
 0x302   : > { %v2786_v41 = vpack.c.bf16 %v2229_v25, %v2228_v47 }
 0x304   : > { %2846 = vst [vmem:[%s4563_s8 + $0x20] sm:$0xff] %v2786_v41   ;;  %v1858_v10 = vpop.permute.xlu1 %1857  ;;  %v1860_v44 = vpop.permute.xlu0 %1859 }
 0x305   : > { %v2071_v49 = vsel %vm2059_vm0, %v1858_v10, %v1986_v45  ;;  %v2072_v23 = vsel %vm2059_vm0, %v1860_v44, %v1988_v58  ;;  %v2139_v58 = vmul.f32 %v2107_v15, %v4425_v20  ;;  %v2108_v44 = vld [vmem:[#allocation8 + $0x80] sm:$0xff] }
 0x306   : > { %v2199_v39 = vmul.f32 %v2167_v3, %v2071_v49  ;;  %v2200_v12 = vmul.f32 %v2168_v62, %v2072_v23  ;;  %v2172_v3 = vld [vmem:[#allocation9 + $0x80] sm:$0xff]  ;;  %v2109_v49 = vld [vmem:[#allocation8 + $0x88] sm:$0xff]  ;;  %v2140_v20 = vmul.f32 %v2108_v44, %v4428_v22  ;;  %v2115_v44 = vld [vmem:[#allocation8 + $0xb8] sm:$0xff] }
 0x307   : > { %v2112_v15 = vld [vmem:[#allocation8 + $0xa0] sm:$0xff] }
 0x308   : > { %v2231_v46 = vadd.f32 %v2199_v39, %v2135_v38  ;;  %v1990_v17 = vpop.permute.xlu1 %1989  ;;  %v1992_v40 = vpop.permute.xlu0 %1991  ;;  %v2232_v31 = vadd.f32 %v2200_v12, %v2136_v30  ;;  %v2110_v12 = vld [vmem:[#allocation8 + $0x90] sm:$0xff] }
 0x30a   : > { %v2791_v5 = vpack.c.bf16 %v2231_v46, %v2230_v1  ;;  %v2141_v46 = vmul.f32 %v2109_v49, %v4441_v42  ;;  %v2142_v42 = vmul.f32 %v2110_v12, %v4444_v48  ;;  %v2179_v49 = vld [vmem:[#allocation9 + $0xb8] sm:$0xff] }
 0x30c   : > { %2847 = vst [vmem:[%s4563_s8 + $0x28] sm:$0xff] %v2791_v5   ;;  %v1862_v29 = vpop.permute.xlu1 %1861  ;;  %v1864_v7 = vpop.permute.xlu0 %1863 }
 0x30d   : > { %v2073_v8 = vsel %vm2059_vm0, %v1862_v29, %v1990_v17  ;;  %v2074_v14 = vsel %vm2059_vm0, %v1864_v7, %v1992_v40  ;;  %v2111_v29 = vld [vmem:[#allocation8 + $0x98] sm:$0xff] }
 0x30e   : > { %v2201_v18 = vmul.f32 %v2169_v57, %v2073_v8  ;;  %v2202_v47 = vmul.f32 %v2170_v9, %v2074_v14  ;;  %v2175_v7 = vld [vmem:[#allocation9 + $0x98] sm:$0xff]  ;;  %v2176_v14 = vld [vmem:[#allocation9 + $0xa0] sm:$0xff] }
 0x310   : > { %v2233_v19 = vadd.f32 %v2201_v18, %v2137_v59  ;;  %v1994_v35 = vpop.permute.xlu1 %1993  ;;  %v1996_v4 = vpop.permute.xlu0 %1995  ;;  %v2234_v21 = vadd.f32 %v2202_v47, %v2138_v53  ;;  %v2143_v18 = vmul.f32 %v2111_v29, %v4457_v61  ;;  %v2177_v47 = vld [vmem:[#allocation9 + $0xa8] sm:$0xff]  ;;  %v2144_v61 = vmul.f32 %v2112_v15, %v4460_v11 }
 0x312   : > { %v2796_v24 = vpack.c.bf16 %v2233_v19, %v2232_v31 }
 0x314   : > { %2848 = vst [vmem:[%s4563_s8 + $0x30] sm:$0xff] %v2796_v24   ;;  %v1866_v25 = vpop.permute.xlu1 %1865  ;;  %v1868_v45 = vpop.permute.xlu0 %1867 }
 0x315   : > { %v2075_v32 = vsel %vm2059_vm0, %v1866_v25, %v1994_v35  ;;  %v2076_v13 = vsel %vm2059_vm0, %v1868_v45, %v1996_v4 }
 0x316   : > { %v2203_v26 = vmul.f32 %v2171_v33, %v2075_v32  ;;  %v2204_v38 = vmul.f32 %v2172_v3, %v2076_v13  ;;  %v2113_v33 = vld [vmem:[#allocation8 + $0xa8] sm:$0xff] }
 0x317   : > { %v2145_v53 = vmul.f32 %v2113_v33, %v4473_v27 }
 0x318   : > { %v2235_v41 = vadd.f32 %v2203_v26, %v2139_v58  ;;  %v1998_v37 = vpop.permute.xlu1 %1997  ;;  %v2000_v55 = vpop.permute.xlu0 %1999  ;;  %v2236_v40 = vadd.f32 %v2204_v38, %v2140_v20 }
 0x31a   : > { %v2801_v10 = vpack.c.bf16 %v2235_v41, %v2234_v21 }
 0x31c   : > { %2849 = vst [vmem:[%s4563_s8 + $0x38] sm:$0xff] %v2801_v10   ;;  %v1870_v39 = vpop.permute.xlu1 %1869  ;;  %v1872_v1 = vpop.permute.xlu0 %1871  ;;  %v2114_v10 = vld [vmem:[#allocation8 + $0xb0] sm:$0xff] }
 0x31d   : > { %v2077_v54 = vsel %vm2059_vm0, %v1870_v39, %v1998_v37  ;;  %v2078_v51 = vsel %vm2059_vm0, %v1872_v1, %v2000_v55  ;;  %v2178_v55 = vld [vmem:[#allocation9 + $0xb0] sm:$0xff]  ;;  %v2146_v27 = vmul.f32 %v2114_v10, %v4476_v28  ;;  %v2147_v1 = vmul.f32 %v2115_v44, %v4489_v43 }
 0x31e   : > { %v2205_v17 = vmul.f32 %v2173_v6, %v2077_v54  ;;  %v2206_v8 = vmul.f32 %v2174_v50, %v2078_v51  ;;  %v2116_v50 = vld [vmem:[#allocation8 + $0xc0] sm:$0xff]  ;;  %v2117_v51 = vld [vmem:[#allocation8 + $0xc8] sm:$0xff] }
 0x31f   : > { %v2148_v43 = vmul.f32 %v2116_v50, %v4492_v52 }
 0x320   : > { %v2237_v62 = vadd.f32 %v2205_v17, %v2141_v46  ;;  %v2002_v23 = vpop.permute.xlu1 %2001  ;;  %v2004_v5 = vpop.permute.xlu0 %2003  ;;  %v2238_v19 = vadd.f32 %v2206_v8, %v2142_v42  ;;  %v2149_v8 = vmul.f32 %v2117_v51, %v4505_v63 }
 0x322   : > { %v2806_v57 = vpack.c.bf16 %v2237_v62, %v2236_v40  ;;  %v2180_v62 = vld [vmem:[#allocation9 + $0xc0] sm:$0xff] }
 0x324   : > { %2850 = vst [vmem:[%s4563_s8 + $0x40] sm:$0xff] %v2806_v57   ;;  %v1874_v30 = vpop.permute.xlu1 %1873  ;;  %v1876_v59 = vpop.permute.xlu0 %1875  ;;  %v2181_v57 = vld [vmem:[#allocation9 + $0xc8] sm:$0xff] }
 0x325   : > { %v2079_v22 = vsel %vm2059_vm0, %v1874_v30, %v2002_v23  ;;  %v2080_v24 = vsel %vm2059_vm0, %v1876_v59, %v2004_v5 }
 0x326   : > { %v2207_v31 = vmul.f32 %v2175_v7, %v2079_v22  ;;  %v2208_v25 = vmul.f32 %v2176_v14, %v2080_v24  ;;  %v2183_v14 = vld [vmem:[#allocation9 + $0xd8] sm:$0xff] }
 0x328   : > { %v2239_v35 = vadd.f32 %v2207_v31, %v2143_v18  ;;  %v2006_v4 = vpop.permute.xlu1 %2005  ;;  %v2008_v9 = vpop.permute.xlu0 %2007  ;;  %v2240_v26 = vadd.f32 %v2208_v25, %v2144_v61  ;;  %v2182_v31 = vld [vmem:[#allocation9 + $0xd0] sm:$0xff] }
 0x32a   : > { %v2811_v60 = vpack.c.bf16 %v2239_v35, %v2238_v19 }
 0x32c   : > { %2851 = vst [vmem:[%s4563_s8 + $0x48] sm:$0xff] %v2811_v60   ;;  %v1878_v45 = vpop.permute.xlu1 %1877  ;;  %v1880_v32 = vpop.permute.xlu0 %1879 }
 0x32d   : > { %v2081_v48 = vsel %vm2059_vm0, %v1878_v45, %v2006_v4  ;;  %v2082_v3 = vsel %vm2059_vm0, %v1880_v32, %v2008_v9  ;;  %v2118_v4 = vld [vmem:[#allocation8 + $0xd0] sm:$0xff]  ;;  %v2119_v9 = vld [vmem:[#allocation8 + $0xd8] sm:$0xff] }
 0x32e   : > { %v2209_v58 = vmul.f32 %v2177_v47, %v2081_v48  ;;  %v2210_v6 = vmul.f32 %v2178_v55, %v2082_v3  ;;  %v2150_v63 = vmul.f32 %v2118_v4, %v4508_v16  ;;  %v2151_v15 = vmul.f32 %v2119_v9, %v4521_v36  ;;  %v2184_v48 = vld [vmem:[#allocation9 + $0xe0] sm:$0xff] }
 0x330   : > { %v2241_v21 = vadd.f32 %v2209_v58, %v2145_v53  ;;  %v2010_v41 = vpop.permute.xlu1 %2009  ;;  %v2012_v37 = vpop.permute.xlu0 %2011  ;;  %v2242_v20 = vadd.f32 %v2210_v6, %v2146_v27  ;;  %v2122_v27 = vld [vmem:[#allocation8 + $0xf0] sm:$0xff] }
 0x332   : > { %v2816_v13 = vpack.c.bf16 %v2241_v21, %v2240_v26  ;;  %v2120_v26 = vld [vmem:[#allocation8 + $0xe0] sm:$0xff]  ;;  %v2121_v21 = vld [vmem:[#allocation8 + $0xe8] sm:$0xff] }
 0x333   : > { %v2152_v55 = vmul.f32 %v2120_v26, %v4524_v56  ;;  %v2153_v3 = vmul.f32 %v2121_v21, %v4537_v0 }
 0x334   : > { %2852 = vst [vmem:[%s4563_s8 + $0x50] sm:$0xff] %v2816_v13   ;;  %v1882_v38 = vpop.permute.xlu1 %1881  ;;  %v1884_v39 = vpop.permute.xlu0 %1883 }
 0x335   : > { %v2083_v11 = vsel %vm2059_vm0, %v1882_v38, %v2010_v41  ;;  %v2084_v23 = vsel %vm2059_vm0, %v1884_v39, %v2012_v37  ;;  %v2185_v41 = vld [vmem:[#allocation9 + $0xe8] sm:$0xff]  ;;  %v2186_v38 = vld [vmem:[#allocation9 + $0xf0] sm:$0xff] }
 0x336   : > { %v2211_v54 = vmul.f32 %v2179_v49, %v2083_v11  ;;  %v2212_v12 = vmul.f32 %v2180_v62, %v2084_v23 }
 0x338   : > { %v2243_v46 = vadd.f32 %v2211_v54, %v2147_v1  ;;  %v2014_v17 = vpop.permute.xlu1 %2013  ;;  %v2016_v40 = vpop.permute.xlu0 %2015  ;;  %v2244_v59 = vadd.f32 %v2212_v12, %v2148_v43  ;;  %v2123_v1 = vld [vmem:[#allocation8 + $0xf8] sm:$0xff] }
 0x339   : > { %v2187_v54 = vld [vmem:[#allocation9 + $0xf8] sm:$0xff] }
 0x33a   : > { %v2821_v5 = vpack.c.bf16 %v2243_v46, %v2242_v20  ;;  %v2154_v46 = vmul.f32 %v2122_v27, %v4540_v2 }
 0x33c   : > { %2853 = vst [vmem:[%s4563_s8 + $0x58] sm:$0xff] %v2821_v5   ;;  %v1886_v29 = vpop.permute.xlu1 %1885  ;;  %v1888_v7 = vpop.permute.xlu0 %1887 }
 0x33d   : > { %v2085_v28 = vsel %vm2059_vm0, %v1886_v29, %v2014_v17  ;;  %v2086_v19 = vsel %vm2059_vm0, %v1888_v7, %v2016_v40  ;;  %v2155_v17 = vmul.f32 %v2123_v1, %v4551_v34 }
 0x33e   : > { %v2213_v30 = vmul.f32 %v2181_v57, %v2085_v28  ;;  %v2214_v24 = vmul.f32 %v2182_v31, %v2086_v19 }
 0x340   : > { %v2245_v22 = vadd.f32 %v2213_v30, %v2149_v8  ;;  %v2018_v42 = vpop.permute.xlu1 %2017  ;;  %v2020_v18 = vpop.permute.xlu0 %2019  ;;  %v2246_v25 = vadd.f32 %v2214_v24, %v2150_v63 }
 0x342   : > { %v2826_v35 = vpack.c.bf16 %v2245_v22, %v2244_v59 }
 0x344   : > { %2854 = vst [vmem:[%s4563_s8 + $0x60] sm:$0xff] %v2826_v35   ;;  %v1890_v60 = vpop.permute.xlu1 %1889  ;;  %v1892_v47 = vpop.permute.xlu0 %1891 }
 0x345   : > { %v2087_v52 = vsel %vm2059_vm0, %v1890_v60, %v2018_v42  ;;  %v2088_v61 = vsel %vm2059_vm0, %v1892_v47, %v2020_v18 }
 0x346   : > { %v2215_v33 = vmul.f32 %v2183_v14, %v2087_v52  ;;  %v2216_v37 = vmul.f32 %v2184_v48, %v2088_v61 }
 0x348   : > { %v2247_v45 = vadd.f32 %v2215_v33, %v2151_v15  ;;  %v2022_v32 = vpop.permute.xlu1 %2021  ;;  %v2248_v44 = vadd.f32 %v2216_v37, %v2152_v55 }
 0x34a   : > { %v2831_v53 = vpack.c.bf16 %v2247_v45, %v2246_v25  ;;  %v1896_v58 = vpop.permute.xlu0 %1895 }
 0x34c   : > { %2855 = vst [vmem:[%s4563_s8 + $0x68] sm:$0xff] %v2831_v53   ;;  %v1894_v16 = vpop.permute.xlu1 %1893 }
 0x34d   : > { %v2089_v36 = vsel %vm2059_vm0, %v1894_v16, %v2022_v32 }
 0x34e   : > { %v2217_v13 = vmul.f32 %v2185_v41, %v2089_v36  ;;  %v2024_v10 = vpop.permute.xlu0 %2023 }
 0x34f   : > { %v2090_v39 = vsel %vm2059_vm0, %v1896_v58, %v2024_v10 }
 0x350   : > { %v2249_v49 = vadd.f32 %v2217_v13, %v2153_v3  ;;  %v1898_v6 = vpop.permute.xlu1 %1897  ;;  %v2218_v56 = vmul.f32 %v2186_v38, %v2090_v39 }
 0x352   : > { %v2836_v11 = vpack.c.bf16 %v2249_v49, %v2248_v44  ;;  %v2250_v62 = vadd.f32 %v2218_v56, %v2154_v46 }
 0x354   : > { %2856 = vst [vmem:[%s4563_s8 + $0x70] sm:$0xff] %v2836_v11   ;;  %v2026_v0 = vpop.permute.xlu1 %2025 }
 0x355   : > { %v2091_v20 = vsel %vm2059_vm0, %v1898_v6, %v2026_v0 }
 0x356   : > { %v2219_v40 = vmul.f32 %v2187_v54, %v2091_v20 }
 0x358   : > { %v2251_v23 = vadd.f32 %v2219_v40, %v2155_v17 }
 0x35a   : > { %v2841_v5 = vpack.c.bf16 %v2251_v23, %v2250_v62 }
 0x35c   : > { %2857 = vst [vmem:[%s4563_s8 + $0x78] sm:$0xff] %v2841_v5  }
 0x35d   : > { %3563 = shalt.err (!%p3560_p11)
}
 0x35e   : > { %s3564_s3 = scalar_lea.hbm %s4648_s9, 2048  ;;  %s3568_s18 = scalar_lea.hbm %s4796_s7, 16384 }
 0x35f   : > { %p3565_p6 = scmp.ne.s32.totalorder %s4648_s9, %s3564_s3  ;;  %p3569_p13 = scmp.lt.u32.totalorder %s4648_s9, %s4796_s7 }
 0x360   : > { %p3570_p8 = scmp.lt.u32.totalorder %s3568_s18, %s3564_s3  ;;  %p3572_p4 = scmp.lt.u32.totalorder %s3564_s3, %s4648_s9 }
 0x361   : > { %p3566_p9 = pnand %p3565_p6, %p4797_p5 }
 0x362   : > { %p3571_p2 = por %p3570_p8, %p3569_p13 }
 0x363   : > { %p3567_p7 = pneg %p3566_p9 }
 0x364   : > { %p3573_p3 = por %p3572_p4, %p3571_p2 }
 0x366   : > { %p3574_p12 = pnand %p3573_p3, %p3567_p7 }
 0x368   : > { %3577 = shalt.err (!%p3574_p12)
}
 0x369   : > { %s3722_s13 = smov 4  }
 0x36a   : > { %3094 = dma.vmem_to_hbm [thread:$0]  (%p4797_p5), %s4650_s2, 2048, %s4648_s9, %s4655_s21, %s3720_s17, %s3720_s17, %s3722_s13  }
 0x36b PF: > { %s4798_s24 = sld [smem:[#allocation17_spill]]  ;;  %s4799_s5 = sld [smem:[#allocation23_spill]] }
 0x36c   : > { %p3119_p1 = scmp.ge.s32.totalorder %s3708_s6, 2 }
 0x371   : > { %s2445_s4 = sand.u32 1, %s4798_s24   ;;  %p4800_p10 = scmp.ne.s32.totalorder %s4799_s5, 0 }
 0x372   : > { %s2446_s14 = scalar_lea.sflag [#allocation5], %s2445_s4 }
 0x373   : > { %p3111_p0 = pnand %p3119_p1, %p4800_p10 }
 0x375   : > { %3651 = dma.done.wait (!%p3111_p0), %s2446_s14, 2048  }
 0x376   : > { %3653 = vsyncadd (!%p3111_p0), %s2446_s14, 4294965248  ;;  %s25_s6 = sadd.s32 1, %s3708_s6   ;;  %s4802_s18 = sld [smem:[#allocation18_spill]] }
 0x377   : > { %p4686_p11 = scmp.ge.s32.totalorder %s25_s6, 10   ;;  %s4803_s17 = smov %s3952_s19 }
 0x378   : > { %s4804_s2 = sld [smem:[#allocation24_spill]]  ;;  %s4805_s19 = smov %s3664_s20 }
 0x379   : > { %s4806_s20 = smov %s4803_s17  ;;  %s4807_s21 = smov %s3672_s22 }
 0x37a   : > { %s4808_s22 = smov %s3676_s23  ;;  %s4809_s23 = smov %s3942_s12 }
 0x37b   : > { %s4810_s24 = smov %s3684_s25  ;;  %s4811_s25 = smov %s3688_s26 }
 0x37c   : > { %s4812_s26 = smov %s3949_s15  ;;  %s4813_s27 = smov %s3700_s29 }
 0x37d   : > { %s4814_s28 = smov %s3704_s30  ;;  %s4816_s30 = smov %s4822_s16 }
 0x37e   : > { %s4815_s29 = smov %s4804_s2  ;;  %24 = sbr.rel (!%p4686_p11) target bundleno = 19 (0x13), region = 116 }
 0x385   :  { %2451 = vsyncpa [#allocation4], 1 }
 0x386   :  { %2453 = vsyncpa [#allocation4 + $0x1], 1 }
 0x387   :  { %2454 = vsyncpa [#allocation7], 1 }
 0x388   :  { %2456 = vsyncpa [#allocation7 + $0x1], 1 }
 0x389   :  { %2457 = vsyncpa [#allocation10], 1 }
 0x38a   :  { %2458 = vsyncpa [#allocation5], 1 }
 0x38b   :  { %2460 = vsyncpa [#allocation5 + $0x1], 1 }

</bundles_post_ra>
